<compile_context>
chip_gen: v5e
topology: v5e:2x2
jax: 0.10.0
libtpu: 0.0.40
codegen_flags: <defaults>
</compile_context>

<pallas_src>
import numpy as np
import jax
import jax.numpy as jnp
from jax import lax
from jax.experimental import pallas as pl
from jax.experimental.pallas import tpu as pltpu

DTYPE = jnp.float32
SUB = 8                      # sublanes per vreg
LANE = 128                   # lanes per vreg
CHUNK = SUB * LANE           # batch elements per (8,128) chunk


def _cdiv(a, b):
    return -(-a // b)


# ---- compile-time constant folding helpers (None == exactly-zero term) ------
def _cmul(c, row):
    if c == 0.0:
        return None
    if c == 1.0:
        return row
    return c * row


def _add(a, b):
    if a is None:
        return b
    if b is None:
        return a
    return a + b


def _sub(a, b):
    if b is None:
        return a
    if a is None:
        return -b
    return a - b


def _matvec6_const(M, v_rows):
    """6x6 constant matrix @ 6 rows; zero entries fold away at trace time."""
    out = []
    for i in range(6):
        acc = None
        for j in range(6):
            acc = _add(acc, _cmul(M[i][j], v_rows[j]))
        out.append(acc if acc is not None else jnp.zeros_like(v_rows[0]))
    return out


def build_auv_fossen(dt=0.1, mass=100.0, volume=1.0, gravity=9.81, density=1028.0,
                     cog=(0.0, 0.0, 0.0), cob=(0.0, 0.0, 0.2),
                     mtot=None, lin_damp=None, lin_damp_fwd=None, quad_damp=None,
                     prune_rel_tol=1e-6, max_chunks_per_tile=8, core_parallel=None):
    """Build a specialized forward(x, u) for the AUVFossen default parameters."""
    if mtot is None:
        mtot = np.eye(6) * 100.0 + 1e-7            # matches init_param default
    mtot = np.asarray(mtot, np.float64)
    inv_mtot = np.linalg.inv(mtot)                  # one-time host-side setup
    if lin_damp is None:
        lin_damp = [-70.0, -70.0, -700.0, -300.0, -300.0, -100.0]
    if lin_damp_fwd is None:
        lin_damp_fwd = [0.0] * 6
    if quad_damp is None:
        quad_damp = [-740.0, -990.0, -1800.0, -670.0, -770.0, -520.0]

    def _prune(m):
        # Drop negligible entries (|entry| < prune_rel_tol * max|entry|); the default
        # mTot / invM become exactly diagonal, well inside the 1e-3 tolerance.
        m = np.asarray(m, np.float64)
        thr = prune_rel_tol * float(np.max(np.abs(m)))
        m = np.where(np.abs(m) < thr, 0.0, m)
        return [[float(v) for v in row] for row in m]

    MTOT = _prune(mtot)
    INVM = _prune(inv_mtot)
    LIN_D = [float(v) for v in lin_damp]
    LIN_DF = [float(v) for v in lin_damp_fwd]
    QUAD_D = [float(v) for v in quad_damp]
    DT = float(dt)
    HDT = float(dt) / 2.0

    fbg_sc = float(-mass * gravity)                 # gravity force scale
    fbb_sc = float(volume * density * gravity)      # buoyancy force scale
    F_C = fbg_sc + fbb_sc                           # combined restoring force scale
    M_C = [fbg_sc * float(cog[i]) + fbb_sc * float(cob[i]) for i in range(3)]

    # ---- dynamics derivative on one (8,128) chunk --------------------------
    def x_dot(xd, read_u):
        """xd: 10 rows [qx,qy,qz,qw, v1,v2,v3, w1,w2,w3]; returns 13 rows."""
        qx, qy, qz, qw = xd[0], xd[1], xd[2], xd[3]
        v1, v2, v3 = xd[4], xd[5], xd[6]
        w1, w2, w3 = xd[7], xd[8], xd[9]

        r11 = 1.0 - 2.0 * (qy * qy + qz * qz)
        r12 = 2.0 * (qx * qy - qz * qw)
        r13 = 2.0 * (qx * qz + qy * qw)
        r21 = 2.0 * (qx * qy + qz * qw)
        r22 = 1.0 - 2.0 * (qx * qx + qz * qz)
        r23 = 2.0 * (qy * qz - qx * qw)
        r31 = 2.0 * (qx * qz - qy * qw)
        r32 = 2.0 * (qy * qz + qx * qw)
        r33 = 1.0 - 2.0 * (qx * qx + qy * qy)

        pd = [
            r11 * v1 + r12 * v2 + r13 * v3,
            r21 * v1 + r22 * v2 + r23 * v3,
            r31 * v1 + r32 * v2 + r33 * v3,
            0.5 * (-qx * w1 - qy * w2 - qz * w3),
            0.5 * ( qw * w1 - qz * w2 + qy * w3),
            0.5 * ( qz * w1 + qw * w2 - qx * w3),
            0.5 * (-qy * w1 + qx * w2 + qw * w3),
        ]

        v_rows = [v1, v2, v3, w1, w2, w3]

        # Diagonal damping D(v) v; zero linDampFwd entries fold away.
        Dv = []
        for i in range(6):
            coef = -LIN_D[i] - QUAD_D[i] * jnp.abs(v_rows[i])
            if LIN_DF[i] != 0.0:
                coef = coef - LIN_DF[i] * v_rows[i]
            Dv.append(coef * v_rows[i])

        # Coriolis C(v) v from a = M11 v + M12 w, b = M21 v + M22 w.
        a1, a2, a3, b1, b2, b3 = _matvec6_const(MTOT, v_rows)
        Cv = [
            -(a2 * w3 - a3 * w2),
            -(a3 * w1 - a1 * w3),
            -(a1 * w2 - a2 * w1),
            -(a2 * v3 - a3 * v2) - (b2 * w3 - b3 * w2),
            -(a3 * v1 - a1 * v3) - (b3 * w1 - b1 * w3),
            -(a1 * v2 - a2 * v1) - (b1 * w2 - b2 * w1),
        ]

        # Restoring forces: g_lin = -(fbg+fbb) = -F_C * r3; g_ang = -(m_c x r3).
        r3 = [r31, r32, r33]
        g_vec = [
            _cmul(-F_C, r3[0]), _cmul(-F_C, r3[1]), _cmul(-F_C, r3[2]),
            _sub(_cmul(M_C[2], r3[1]), _cmul(M_C[1], r3[2])),
            _sub(_cmul(M_C[0], r3[2]), _cmul(M_C[2], r3[0])),
            _sub(_cmul(M_C[1], r3[0]), _cmul(M_C[0], r3[1])),
        ]

        rhs = []
        for i in range(6):
            r = read_u(i) - Cv[i] - Dv[i]      # u read at point of use
            if g_vec[i] is not None:
                r = r - g_vec[i]
            rhs.append(r)

        v_dot = _matvec6_const(INVM, rhs)
        return pd + v_dot

    # ---- kernel: loop over 128-lane chunks inside the block -----------------
    def kernel(x_ref, u_ref, o_ref):
        n_chunks = x_ref.shape[1]                   # static block-shape dim

        def do_chunk(c):
            # Stage 1: only quaternion + velocity rows feed the derivative.
            xd = [x_ref[i, c] for i in range(3, 13)]
            k1 = x_dot(xd, lambda i: u_ref[i, c])
            # RK2 restructure: build stage-2 state xk (dynamic rows only) and the
            # half-step accumulator now, so xd/k1 die before stage 2.
            xk = [xd[i] + DT * k1[i + 3] for i in range(10)]
            acc = [HDT * k1[i] for i in range(13)]
            for i in range(10):
                acc[i + 3] = acc[i + 3] + xd[i]
            # Stage 2.
            k2 = x_dot(xk, lambda i: u_ref[i, c])
            xn = [None] * 13
            for i in range(3):
                # Position rows of x are only needed here; re-read them now.
                xn[i] = x_ref[i, c] + (acc[i] + HDT * k2[i])
            for i in range(3, 13):
                xn[i] = acc[i] + HDT * k2[i]
            # Quaternion renorm: sum of 4 squares (VPU) + rsqrt (EUP).
            inv_n = lax.rsqrt(xn[3] * xn[3] + xn[4] * xn[4]
                              + xn[5] * xn[5] + xn[6] * xn[6])
            for i in range(13):
                val = xn[i] * inv_n if 3 <= i <= 6 else xn[i]
                o_ref[i, c] = val.astype(o_ref.dtype)

        if n_chunks == 1:
            do_chunk(0)
        else:
            def body(c, carry):
                do_chunk(c)
                return carry
            lax.fori_loop(0, n_chunks, body, 0)

    # ---- wrapper -------------------------------------------------------------
    def forward(x, u):
        """x: (B,13,1), u: (B,6,1) -> (B,13,1); one RK2 step."""
        B = x.shape[0]
        C_total = max(_cdiv(B, CHUNK), 1)
        # Force >= 2 grid steps when possible so Pallas actually double-buffers.
        cpt = 1 if C_total == 1 else min(max_chunks_per_tile, _cdiv(C_total, 2))
        n_tiles = _cdiv(C_total, cpt)
        C_pad = n_tiles * cpt
        Bp = C_pad * CHUNK

        # TODO(synk): for multi-step rollouts keep the state resident in this
        # (13, C, 8, 128) batch-on-lanes layout across calls (the pack/unpack
        # relayout below costs ~2-3x the kernel's own HBM traffic).
        x2d = x[:, :, 0].astype(DTYPE)
        u2d = u[:, :, 0].astype(DTYPE)
        # Padded lanes get an identity quaternion so the renorm never sees norm 0.
        xp = jnp.zeros((Bp, 13), DTYPE).at[:, 6].set(1.0).at[:B].set(x2d)
        up = jnp.zeros((Bp, 6), DTYPE).at[:B].set(u2d)
        x4 = xp.T.reshape(13, C_pad, SUB, LANE)
        u4 = up.T.reshape(6, C_pad, SUB, LANE)

        dims = ("parallel",)
        use_cp = core_parallel
        if use_cp is None:
            try:
                use_cp = n_tiles >= 2 and "v7" in jax.devices()[0].device_kind.lower()
            except Exception:
                use_cp = False
        if use_cp:
            dims = (pltpu.CORE_PARALLEL,)          # v7x: shard tiles across both TCs

        out4 = pl.pallas_call(
            kernel,
            out_shape=jax.ShapeDtypeStruct((13, C_pad, SUB, LANE), DTYPE),
            grid=(n_tiles,),
            in_specs=[
                pl.BlockSpec((13, cpt, SUB, LANE), lambda i: (0, i, 0, 0)),
                pl.BlockSpec((6, cpt, SUB, LANE), lambda i: (0, i, 0, 0)),
            ],
            out_specs=pl.BlockSpec((13, cpt, SUB, LANE), lambda i: (0, i, 0, 0)),
            compiler_params=pltpu.CompilerParams(dimension_semantics=dims),
            cost_estimate=pl.CostEstimate(
                flops=1300 * Bp,
                transcendentals=Bp,
                bytes_accessed=(13 + 6 + 13) * 4 * Bp),
        )(x4, u4)

        out2d = out4.reshape(13, Bp).T[:B]
        return out2d[:, :, None]

    return jax.jit(forward)


# ---- pure-JAX reference (direct port of the PyTorch module) ------------------
def auv_fossen_reference(x, u, dt=0.1):
    f32 = jnp.float32
    mass, volume, gravity, density = 100.0, 1.0, 9.81, 1028.0
    cog = jnp.array([0.0, 0.0, 0.0], f32)
    cob = jnp.array([0.0, 0.0, 0.2], f32)
    z3 = jnp.array([0.0, 0.0, 1.0], f32)
    mtot = jnp.eye(6, dtype=f32) * 100.0 + 1e-7
    inv_mtot = jnp.linalg.inv(mtot)
    linD = jnp.diag(jnp.array([-70.0, -70.0, -700.0, -300.0, -300.0, -100.0], f32))
    linDF = jnp.zeros((6, 6), f32)
    quadD = jnp.diag(jnp.array([-740.0, -990.0, -1800.0, -670.0, -770.0, -520.0], f32))

    def skew(vec):  # (B,3) -> (B,3,3)
        zz = jnp.zeros_like(vec[:, 0])
        return jnp.stack([
            jnp.stack([zz, -vec[:, 2], vec[:, 1]], -1),
            jnp.stack([vec[:, 2], zz, -vec[:, 0]], -1),
            jnp.stack([-vec[:, 1], vec[:, 0], zz], -1)], -2)

    def x_dot(xs, us):
        q = xs[:, 3:7, 0]
        qx, qy, qz, qw = q[:, 0], q[:, 1], q[:, 2], q[:, 3]
        R = jnp.stack([
            jnp.stack([1 - 2 * (qy**2 + qz**2), 2 * (qx*qy - qz*qw), 2 * (qx*qz + qy*qw)], -1),
            jnp.stack([2 * (qx*qy + qz*qw), 1 - 2 * (qx**2 + qz**2), 2 * (qy*qz - qx*qw)], -1),
            jnp.stack([2 * (qx*qz - qy*qw), 2 * (qy*qz + qx*qw), 1 - 2 * (qx**2 + qy**2)], -1)],
            -2)
        T = 0.5 * jnp.stack([
            jnp.stack([-qx, -qy, -qz], -1),
            jnp.stack([qw, -qz, qy], -1),
            jnp.stack([qz, qw, -qx], -1),
            jnp.stack([-qy, qx, qw], -1)], -2)
        v = xs[:, 7:13, 0]
        vlin, vang = v[:, 0:3], v[:, 3:6]
        pd_lin = jnp.einsum('bij,bj->bi', R, vlin)
        pd_quat = jnp.einsum('bij,bj->bi', T, vang)
        diag_v = jax.vmap(jnp.diag)(v)
        Dmat = -linD[None] - v[:, :, None] * linDF[None] - quadD[None] * jnp.abs(diag_v)
        Dv = jnp.einsum('bij,bj->bi', Dmat, v)
        a = vlin @ mtot[0:3, 0:3].T + vang @ mtot[0:3, 3:6].T
        b = vlin @ mtot[3:6, 0:3].T + vang @ mtot[3:6, 3:6].T
        s12, s22 = -skew(a), -skew(b)
        Cv = jnp.concatenate([
            jnp.einsum('bij,bj->bi', s12, vang),
            jnp.einsum('bij,bj->bi', s12, vlin) + jnp.einsum('bij,bj->bi', s22, vang)], -1)
        fng = -mass * gravity * z3
        fnb = volume * density * gravity * z3
        fbg = jnp.einsum('bji,j->bi', R, fng)
        fbb = jnp.einsum('bji,j->bi', R, fnb)
        mbg = jnp.cross(jnp.broadcast_to(cog, fbg.shape), fbg)
        mbb = jnp.cross(jnp.broadcast_to(cob, fbb.shape), fbb)
        g_vec = -jnp.concatenate([fbg + fbb, mbg + mbb], -1)
        rhs = us[:, :, 0] - Cv - Dv - g_vec
        vDot = rhs @ inv_mtot.T
        return jnp.concatenate([pd_lin, pd_quat, vDot], -1)[:, :, None]

    k1 = x_dot(x, u)
    k2 = x_dot(x + dt * k1, u)
    xn = x + dt / 2.0 * (k1 + k2)
    quat = xn[:, 3:7]
    norm = jnp.sqrt(jnp.sum(quat * quat, axis=1, keepdims=True))
    return xn.at[:, 3:7].set(quat / norm)


if __name__ == "__main__":
    key = jax.random.PRNGKey(0)
    kx, ku = jax.random.split(key)
    B = 2
    x = jax.random.normal(kx, (B, 13, 1), dtype=DTYPE)
    u = jax.random.normal(ku, (B, 6, 1), dtype=DTYPE)

    forward = build_auv_fossen(dt=0.1)
    out = forward(x, u)
    jax.block_until_ready(out)
    assert out.shape == (B, 13, 1)

    ref = auv_fossen_reference(x, u, dt=0.1)
    max_err = float(jnp.max(jnp.abs(out - ref)))
    assert jnp.allclose(out, ref, rtol=1e-3, atol=1e-3), f"max_err={max_err}"
    print("KERNEL_OK")
</pallas_src>

<mosaic_0001>
module attributes {stable_mosaic.version = 11 : i64} {
  func.func @kernel(%arg0: i32, %arg1: memref<13x1x8x128xf32, #tpu.memory_space<vmem>>, %arg2: memref<6x1x8x128xf32, #tpu.memory_space<vmem>>, %arg3: memref<13x1x8x128xf32, #tpu.memory_space<vmem>>) attributes {dimension_semantics = [#tpu.dimension_semantics<parallel>], iteration_bounds = array<i64: 1>, scalar_prefetch = 0 : i64, scratch_operands = 0 : i64, tpu.core_type = #tpu.core_type<tc>, window_params = [{transform_indices = @transform_0, window_bounds = array<i64: 13, 1, 8, 128>}, {transform_indices = @transform_1, window_bounds = array<i64: 6, 1, 8, 128>}, {transform_indices = @transform_2, window_bounds = array<i64: 13, 1, 8, 128>}]} {
    %c3 = arith.constant 3 : index
    %c0 = arith.constant 0 : index
    %c0_0 = arith.constant 0 : index
    %c0_1 = arith.constant 0 : index
    %0 = vector.load %arg1[%c3, %c0, %c0_0, %c0_1] : memref<13x1x8x128xf32, #tpu.memory_space<vmem>>, vector<1x1x8x128xf32>
    %1 = vector.shape_cast %0 : vector<1x1x8x128xf32> to vector<8x128xf32>
    %c4 = arith.constant 4 : index
    %c0_2 = arith.constant 0 : index
    %c0_3 = arith.constant 0 : index
    %c0_4 = arith.constant 0 : index
    %2 = vector.load %arg1[%c4, %c0_2, %c0_3, %c0_4] : memref<13x1x8x128xf32, #tpu.memory_space<vmem>>, vector<1x1x8x128xf32>
    %3 = vector.shape_cast %2 : vector<1x1x8x128xf32> to vector<8x128xf32>
    %c5 = arith.constant 5 : index
    %c0_5 = arith.constant 0 : index
    %c0_6 = arith.constant 0 : index
    %c0_7 = arith.constant 0 : index
    %4 = vector.load %arg1[%c5, %c0_5, %c0_6, %c0_7] : memref<13x1x8x128xf32, #tpu.memory_space<vmem>>, vector<1x1x8x128xf32>
    %5 = vector.shape_cast %4 : vector<1x1x8x128xf32> to vector<8x128xf32>
    %c6 = arith.constant 6 : index
    %c0_8 = arith.constant 0 : index
    %c0_9 = arith.constant 0 : index
    %c0_10 = arith.constant 0 : index
    %6 = vector.load %arg1[%c6, %c0_8, %c0_9, %c0_10] : memref<13x1x8x128xf32, #tpu.memory_space<vmem>>, vector<1x1x8x128xf32>
    %7 = vector.shape_cast %6 : vector<1x1x8x128xf32> to vector<8x128xf32>
    %c7 = arith.constant 7 : index
    %c0_11 = arith.constant 0 : index
    %c0_12 = arith.constant 0 : index
    %c0_13 = arith.constant 0 : index
    %8 = vector.load %arg1[%c7, %c0_11, %c0_12, %c0_13] : memref<13x1x8x128xf32, #tpu.memory_space<vmem>>, vector<1x1x8x128xf32>
    %9 = vector.shape_cast %8 : vector<1x1x8x128xf32> to vector<8x128xf32>
    %c8 = arith.constant 8 : index
    %c0_14 = arith.constant 0 : index
    %c0_15 = arith.constant 0 : index
    %c0_16 = arith.constant 0 : index
    %10 = vector.load %arg1[%c8, %c0_14, %c0_15, %c0_16] : memref<13x1x8x128xf32, #tpu.memory_space<vmem>>, vector<1x1x8x128xf32>
    %11 = vector.shape_cast %10 : vector<1x1x8x128xf32> to vector<8x128xf32>
    %c9 = arith.constant 9 : index
    %c0_17 = arith.constant 0 : index
    %c0_18 = arith.constant 0 : index
    %c0_19 = arith.constant 0 : index
    %12 = vector.load %arg1[%c9, %c0_17, %c0_18, %c0_19] : memref<13x1x8x128xf32, #tpu.memory_space<vmem>>, vector<1x1x8x128xf32>
    %13 = vector.shape_cast %12 : vector<1x1x8x128xf32> to vector<8x128xf32>
    %c10 = arith.constant 10 : index
    %c0_20 = arith.constant 0 : index
    %c0_21 = arith.constant 0 : index
    %c0_22 = arith.constant 0 : index
    %14 = vector.load %arg1[%c10, %c0_20, %c0_21, %c0_22] : memref<13x1x8x128xf32, #tpu.memory_space<vmem>>, vector<1x1x8x128xf32>
    %15 = vector.shape_cast %14 : vector<1x1x8x128xf32> to vector<8x128xf32>
    %c11 = arith.constant 11 : index
    %c0_23 = arith.constant 0 : index
    %c0_24 = arith.constant 0 : index
    %c0_25 = arith.constant 0 : index
    %16 = vector.load %arg1[%c11, %c0_23, %c0_24, %c0_25] : memref<13x1x8x128xf32, #tpu.memory_space<vmem>>, vector<1x1x8x128xf32>
    %17 = vector.shape_cast %16 : vector<1x1x8x128xf32> to vector<8x128xf32>
    %c12 = arith.constant 12 : index
    %c0_26 = arith.constant 0 : index
    %c0_27 = arith.constant 0 : index
    %c0_28 = arith.constant 0 : index
    %18 = vector.load %arg1[%c12, %c0_26, %c0_27, %c0_28] : memref<13x1x8x128xf32, #tpu.memory_space<vmem>>, vector<1x1x8x128xf32>
    %19 = vector.shape_cast %18 : vector<1x1x8x128xf32> to vector<8x128xf32>
    %20 = arith.mulf %3, %3 : vector<8x128xf32>
    %21 = arith.mulf %5, %5 : vector<8x128xf32>
    %22 = arith.addf %20, %21 : vector<8x128xf32>
    %cst = arith.constant 2.000000e+00 : f32
    %23 = vector.broadcast %cst : f32 to vector<8x128xf32>
    %24 = arith.mulf %23, %22 : vector<8x128xf32>
    %cst_29 = arith.constant 1.000000e+00 : f32
    %25 = vector.broadcast %cst_29 : f32 to vector<8x128xf32>
    %26 = arith.subf %25, %24 : vector<8x128xf32>
    %27 = arith.mulf %1, %3 : vector<8x128xf32>
    %28 = arith.mulf %5, %7 : vector<8x128xf32>
    %29 = arith.subf %27, %28 : vector<8x128xf32>
    %cst_30 = arith.constant 2.000000e+00 : f32
    %30 = vector.broadcast %cst_30 : f32 to vector<8x128xf32>
    %31 = arith.mulf %30, %29 : vector<8x128xf32>
    %32 = arith.mulf %1, %5 : vector<8x128xf32>
    %33 = arith.mulf %3, %7 : vector<8x128xf32>
    %34 = arith.addf %32, %33 : vector<8x128xf32>
    %cst_31 = arith.constant 2.000000e+00 : f32
    %35 = vector.broadcast %cst_31 : f32 to vector<8x128xf32>
    %36 = arith.mulf %35, %34 : vector<8x128xf32>
    %37 = arith.mulf %1, %3 : vector<8x128xf32>
    %38 = arith.mulf %5, %7 : vector<8x128xf32>
    %39 = arith.addf %37, %38 : vector<8x128xf32>
    %cst_32 = arith.constant 2.000000e+00 : f32
    %40 = vector.broadcast %cst_32 : f32 to vector<8x128xf32>
    %41 = arith.mulf %40, %39 : vector<8x128xf32>
    %42 = arith.mulf %1, %1 : vector<8x128xf32>
    %43 = arith.mulf %5, %5 : vector<8x128xf32>
    %44 = arith.addf %42, %43 : vector<8x128xf32>
    %cst_33 = arith.constant 2.000000e+00 : f32
    %45 = vector.broadcast %cst_33 : f32 to vector<8x128xf32>
    %46 = arith.mulf %45, %44 : vector<8x128xf32>
    %cst_34 = arith.constant 1.000000e+00 : f32
    %47 = vector.broadcast %cst_34 : f32 to vector<8x128xf32>
    %48 = arith.subf %47, %46 : vector<8x128xf32>
    %49 = arith.mulf %3, %5 : vector<8x128xf32>
    %50 = arith.mulf %1, %7 : vector<8x128xf32>
    %51 = arith.subf %49, %50 : vector<8x128xf32>
    %cst_35 = arith.constant 2.000000e+00 : f32
    %52 = vector.broadcast %cst_35 : f32 to vector<8x128xf32>
    %53 = arith.mulf %52, %51 : vector<8x128xf32>
    %54 = arith.mulf %1, %5 : vector<8x128xf32>
    %55 = arith.mulf %3, %7 : vector<8x128xf32>
    %56 = arith.subf %54, %55 : vector<8x128xf32>
    %cst_36 = arith.constant 2.000000e+00 : f32
    %57 = vector.broadcast %cst_36 : f32 to vector<8x128xf32>
    %58 = arith.mulf %57, %56 : vector<8x128xf32>
    %59 = arith.mulf %3, %5 : vector<8x128xf32>
    %60 = arith.mulf %1, %7 : vector<8x128xf32>
    %61 = arith.addf %59, %60 : vector<8x128xf32>
    %cst_37 = arith.constant 2.000000e+00 : f32
    %62 = vector.broadcast %cst_37 : f32 to vector<8x128xf32>
    %63 = arith.mulf %62, %61 : vector<8x128xf32>
    %64 = arith.mulf %1, %1 : vector<8x128xf32>
    %65 = arith.mulf %3, %3 : vector<8x128xf32>
    %66 = arith.addf %64, %65 : vector<8x128xf32>
    %cst_38 = arith.constant 2.000000e+00 : f32
    %67 = vector.broadcast %cst_38 : f32 to vector<8x128xf32>
    %68 = arith.mulf %67, %66 : vector<8x128xf32>
    %cst_39 = arith.constant 1.000000e+00 : f32
    %69 = vector.broadcast %cst_39 : f32 to vector<8x128xf32>
    %70 = arith.subf %69, %68 : vector<8x128xf32>
    %71 = arith.mulf %26, %9 : vector<8x128xf32>
    %72 = arith.mulf %31, %11 : vector<8x128xf32>
    %73 = arith.addf %71, %72 : vector<8x128xf32>
    %74 = arith.mulf %36, %13 : vector<8x128xf32>
    %75 = arith.addf %73, %74 : vector<8x128xf32>
    %76 = arith.mulf %41, %9 : vector<8x128xf32>
    %77 = arith.mulf %48, %11 : vector<8x128xf32>
    %78 = arith.addf %76, %77 : vector<8x128xf32>
    %79 = arith.mulf %53, %13 : vector<8x128xf32>
    %80 = arith.addf %78, %79 : vector<8x128xf32>
    %81 = arith.mulf %58, %9 : vector<8x128xf32>
    %82 = arith.mulf %63, %11 : vector<8x128xf32>
    %83 = arith.addf %81, %82 : vector<8x128xf32>
    %84 = arith.mulf %70, %13 : vector<8x128xf32>
    %85 = arith.addf %83, %84 : vector<8x128xf32>
    %cst_40 = arith.constant 0.000000e+00 : f32
    %86 = vector.broadcast %cst_40 : f32 to vector<8x128xf32>
    %87 = arith.subf %86, %1 : vector<8x128xf32>
    %88 = arith.mulf %87, %15 : vector<8x128xf32>
    %89 = arith.mulf %3, %17 : vector<8x128xf32>
    %90 = arith.subf %88, %89 : vector<8x128xf32>
    %91 = arith.mulf %5, %19 : vector<8x128xf32>
    %92 = arith.subf %90, %91 : vector<8x128xf32>
    %cst_41 = arith.constant 5.000000e-01 : f32
    %93 = vector.broadcast %cst_41 : f32 to vector<8x128xf32>
    %94 = arith.mulf %93, %92 : vector<8x128xf32>
    %95 = arith.mulf %7, %15 : vector<8x128xf32>
    %96 = arith.mulf %5, %17 : vector<8x128xf32>
    %97 = arith.subf %95, %96 : vector<8x128xf32>
    %98 = arith.mulf %3, %19 : vector<8x128xf32>
    %99 = arith.addf %97, %98 : vector<8x128xf32>
    %cst_42 = arith.constant 5.000000e-01 : f32
    %100 = vector.broadcast %cst_42 : f32 to vector<8x128xf32>
    %101 = arith.mulf %100, %99 : vector<8x128xf32>
    %102 = arith.mulf %5, %15 : vector<8x128xf32>
    %103 = arith.mulf %7, %17 : vector<8x128xf32>
    %104 = arith.addf %102, %103 : vector<8x128xf32>
    %105 = arith.mulf %1, %19 : vector<8x128xf32>
    %106 = arith.subf %104, %105 : vector<8x128xf32>
    %cst_43 = arith.constant 5.000000e-01 : f32
    %107 = vector.broadcast %cst_43 : f32 to vector<8x128xf32>
    %108 = arith.mulf %107, %106 : vector<8x128xf32>
    %cst_44 = arith.constant 0.000000e+00 : f32
    %109 = vector.broadcast %cst_44 : f32 to vector<8x128xf32>
    %110 = arith.subf %109, %3 : vector<8x128xf32>
    %111 = arith.mulf %110, %15 : vector<8x128xf32>
    %112 = arith.mulf %1, %17 : vector<8x128xf32>
    %113 = arith.addf %111, %112 : vector<8x128xf32>
    %114 = arith.mulf %7, %19 : vector<8x128xf32>
    %115 = arith.addf %113, %114 : vector<8x128xf32>
    %cst_45 = arith.constant 5.000000e-01 : f32
    %116 = vector.broadcast %cst_45 : f32 to vector<8x128xf32>
    %117 = arith.mulf %116, %115 : vector<8x128xf32>
    %118 = math.absf %9 : vector<8x128xf32>
    %cst_46 = arith.constant -7.400000e+02 : f32
    %119 = vector.broadcast %cst_46 : f32 to vector<8x128xf32>
    %120 = arith.mulf %119, %118 : vector<8x128xf32>
    %cst_47 = arith.constant 7.000000e+01 : f32
    %121 = vector.broadcast %cst_47 : f32 to vector<8x128xf32>
    %122 = arith.subf %121, %120 : vector<8x128xf32>
    %123 = arith.mulf %122, %9 : vector<8x128xf32>
    %124 = math.absf %11 : vector<8x128xf32>
    %cst_48 = arith.constant -9.900000e+02 : f32
    %125 = vector.broadcast %cst_48 : f32 to vector<8x128xf32>
    %126 = arith.mulf %125, %124 : vector<8x128xf32>
    %cst_49 = arith.constant 7.000000e+01 : f32
    %127 = vector.broadcast %cst_49 : f32 to vector<8x128xf32>
    %128 = arith.subf %127, %126 : vector<8x128xf32>
    %129 = arith.mulf %128, %11 : vector<8x128xf32>
    %130 = math.absf %13 : vector<8x128xf32>
    %cst_50 = arith.constant -1.800000e+03 : f32
    %131 = vector.broadcast %cst_50 : f32 to vector<8x128xf32>
    %132 = arith.mulf %131, %130 : vector<8x128xf32>
    %cst_51 = arith.constant 7.000000e+02 : f32
    %133 = vector.broadcast %cst_51 : f32 to vector<8x128xf32>
    %134 = arith.subf %133, %132 : vector<8x128xf32>
    %135 = arith.mulf %134, %13 : vector<8x128xf32>
    %136 = math.absf %15 : vector<8x128xf32>
    %cst_52 = arith.constant -6.700000e+02 : f32
    %137 = vector.broadcast %cst_52 : f32 to vector<8x128xf32>
    %138 = arith.mulf %137, %136 : vector<8x128xf32>
    %cst_53 = arith.constant 3.000000e+02 : f32
    %139 = vector.broadcast %cst_53 : f32 to vector<8x128xf32>
    %140 = arith.subf %139, %138 : vector<8x128xf32>
    %141 = arith.mulf %140, %15 : vector<8x128xf32>
    %142 = math.absf %17 : vector<8x128xf32>
    %cst_54 = arith.constant -7.700000e+02 : f32
    %143 = vector.broadcast %cst_54 : f32 to vector<8x128xf32>
    %144 = arith.mulf %143, %142 : vector<8x128xf32>
    %cst_55 = arith.constant 3.000000e+02 : f32
    %145 = vector.broadcast %cst_55 : f32 to vector<8x128xf32>
    %146 = arith.subf %145, %144 : vector<8x128xf32>
    %147 = arith.mulf %146, %17 : vector<8x128xf32>
    %148 = math.absf %19 : vector<8x128xf32>
    %cst_56 = arith.constant -5.200000e+02 : f32
    %149 = vector.broadcast %cst_56 : f32 to vector<8x128xf32>
    %150 = arith.mulf %149, %148 : vector<8x128xf32>
    %cst_57 = arith.constant 1.000000e+02 : f32
    %151 = vector.broadcast %cst_57 : f32 to vector<8x128xf32>
    %152 = arith.subf %151, %150 : vector<8x128xf32>
    %153 = arith.mulf %152, %19 : vector<8x128xf32>
    %cst_58 = arith.constant 1.000000e+02 : f32
    %154 = vector.broadcast %cst_58 : f32 to vector<8x128xf32>
    %155 = arith.mulf %154, %9 : vector<8x128xf32>
    %cst_59 = arith.constant 1.000000e+02 : f32
    %156 = vector.broadcast %cst_59 : f32 to vector<8x128xf32>
    %157 = arith.mulf %156, %11 : vector<8x128xf32>
    %cst_60 = arith.constant 1.000000e+02 : f32
    %158 = vector.broadcast %cst_60 : f32 to vector<8x128xf32>
    %159 = arith.mulf %158, %13 : vector<8x128xf32>
    %cst_61 = arith.constant 1.000000e+02 : f32
    %160 = vector.broadcast %cst_61 : f32 to vector<8x128xf32>
    %161 = arith.mulf %160, %15 : vector<8x128xf32>
    %cst_62 = arith.constant 1.000000e+02 : f32
    %162 = vector.broadcast %cst_62 : f32 to vector<8x128xf32>
    %163 = arith.mulf %162, %17 : vector<8x128xf32>
    %cst_63 = arith.constant 1.000000e+02 : f32
    %164 = vector.broadcast %cst_63 : f32 to vector<8x128xf32>
    %165 = arith.mulf %164, %19 : vector<8x128xf32>
    %166 = arith.mulf %157, %19 : vector<8x128xf32>
    %167 = arith.mulf %159, %17 : vector<8x128xf32>
    %168 = arith.subf %166, %167 : vector<8x128xf32>
    %cst_64 = arith.constant 0.000000e+00 : f32
    %169 = vector.broadcast %cst_64 : f32 to vector<8x128xf32>
    %170 = arith.subf %169, %168 : vector<8x128xf32>
    %171 = arith.mulf %159, %15 : vector<8x128xf32>
    %172 = arith.mulf %155, %19 : vector<8x128xf32>
    %173 = arith.subf %171, %172 : vector<8x128xf32>
    %cst_65 = arith.constant 0.000000e+00 : f32
    %174 = vector.broadcast %cst_65 : f32 to vector<8x128xf32>
    %175 = arith.subf %174, %173 : vector<8x128xf32>
    %176 = arith.mulf %155, %17 : vector<8x128xf32>
    %177 = arith.mulf %157, %15 : vector<8x128xf32>
    %178 = arith.subf %176, %177 : vector<8x128xf32>
    %cst_66 = arith.constant 0.000000e+00 : f32
    %179 = vector.broadcast %cst_66 : f32 to vector<8x128xf32>
    %180 = arith.subf %179, %178 : vector<8x128xf32>
    %181 = arith.mulf %157, %13 : vector<8x128xf32>
    %182 = arith.mulf %159, %11 : vector<8x128xf32>
    %183 = arith.subf %181, %182 : vector<8x128xf32>
    %cst_67 = arith.constant 0.000000e+00 : f32
    %184 = vector.broadcast %cst_67 : f32 to vector<8x128xf32>
    %185 = arith.subf %184, %183 : vector<8x128xf32>
    %186 = arith.mulf %163, %19 : vector<8x128xf32>
    %187 = arith.mulf %165, %17 : vector<8x128xf32>
    %188 = arith.subf %186, %187 : vector<8x128xf32>
    %189 = arith.subf %185, %188 : vector<8x128xf32>
    %190 = arith.mulf %159, %9 : vector<8x128xf32>
    %191 = arith.mulf %155, %13 : vector<8x128xf32>
    %192 = arith.subf %190, %191 : vector<8x128xf32>
    %cst_68 = arith.constant 0.000000e+00 : f32
    %193 = vector.broadcast %cst_68 : f32 to vector<8x128xf32>
    %194 = arith.subf %193, %192 : vector<8x128xf32>
    %195 = arith.mulf %165, %15 : vector<8x128xf32>
    %196 = arith.mulf %161, %19 : vector<8x128xf32>
    %197 = arith.subf %195, %196 : vector<8x128xf32>
    %198 = arith.subf %194, %197 : vector<8x128xf32>
    %199 = arith.mulf %155, %11 : vector<8x128xf32>
    %200 = arith.mulf %157, %9 : vector<8x128xf32>
    %201 = arith.subf %199, %200 : vector<8x128xf32>
    %cst_69 = arith.constant 0.000000e+00 : f32
    %202 = vector.broadcast %cst_69 : f32 to vector<8x128xf32>
    %203 = arith.subf %202, %201 : vector<8x128xf32>
    %204 = arith.mulf %161, %17 : vector<8x128xf32>
    %205 = arith.mulf %163, %15 : vector<8x128xf32>
    %206 = arith.subf %204, %205 : vector<8x128xf32>
    %207 = arith.subf %203, %206 : vector<8x128xf32>
    %cst_70 = arith.constant -9103.67968 : f32
    %208 = vector.broadcast %cst_70 : f32 to vector<8x128xf32>
    %209 = arith.mulf %208, %58 : vector<8x128xf32>
    %cst_71 = arith.constant -9103.67968 : f32
    %210 = vector.broadcast %cst_71 : f32 to vector<8x128xf32>
    %211 = arith.mulf %210, %63 : vector<8x128xf32>
    %cst_72 = arith.constant -9103.67968 : f32
    %212 = vector.broadcast %cst_72 : f32 to vector<8x128xf32>
    %213 = arith.mulf %212, %70 : vector<8x128xf32>
    %cst_73 = arith.constant 2016.93604 : f32
    %214 = vector.broadcast %cst_73 : f32 to vector<8x128xf32>
    %215 = arith.mulf %214, %63 : vector<8x128xf32>
    %cst_74 = arith.constant 2016.93604 : f32
    %216 = vector.broadcast %cst_74 : f32 to vector<8x128xf32>
    %217 = arith.mulf %216, %58 : vector<8x128xf32>
    %cst_75 = arith.constant 0.000000e+00 : f32
    %218 = vector.broadcast %cst_75 : f32 to vector<8x128xf32>
    %219 = arith.subf %218, %217 : vector<8x128xf32>
    %c0_76 = arith.constant 0 : index
    %c0_77 = arith.constant 0 : index
    %c0_78 = arith.constant 0 : index
    %c0_79 = arith.constant 0 : index
    %220 = vector.load %arg2[%c0_76, %c0_77, %c0_78, %c0_79] : memref<6x1x8x128xf32, #tpu.memory_space<vmem>>, vector<1x1x8x128xf32>
    %221 = vector.shape_cast %220 : vector<1x1x8x128xf32> to vector<8x128xf32>
    %222 = arith.subf %221, %170 : vector<8x128xf32>
    %223 = arith.subf %222, %123 : vector<8x128xf32>
    %224 = arith.subf %223, %209 : vector<8x128xf32>
    %c1 = arith.constant 1 : index
    %c0_80 = arith.constant 0 : index
    %c0_81 = arith.constant 0 : index
    %c0_82 = arith.constant 0 : index
    %225 = vector.load %arg2[%c1, %c0_80, %c0_81, %c0_82] : memref<6x1x8x128xf32, #tpu.memory_space<vmem>>, vector<1x1x8x128xf32>
    %226 = vector.shape_cast %225 : vector<1x1x8x128xf32> to vector<8x128xf32>
    %227 = arith.subf %226, %175 : vector<8x128xf32>
    %228 = arith.subf %227, %129 : vector<8x128xf32>
    %229 = arith.subf %228, %211 : vector<8x128xf32>
    %c2 = arith.constant 2 : index
    %c0_83 = arith.constant 0 : index
    %c0_84 = arith.constant 0 : index
    %c0_85 = arith.constant 0 : index
    %230 = vector.load %arg2[%c2, %c0_83, %c0_84, %c0_85] : memref<6x1x8x128xf32, #tpu.memory_space<vmem>>, vector<1x1x8x128xf32>
    %231 = vector.shape_cast %230 : vector<1x1x8x128xf32> to vector<8x128xf32>
    %232 = arith.subf %231, %180 : vector<8x128xf32>
    %233 = arith.subf %232, %135 : vector<8x128xf32>
    %234 = arith.subf %233, %213 : vector<8x128xf32>
    %c3_86 = arith.constant 3 : index
    %c0_87 = arith.constant 0 : index
    %c0_88 = arith.constant 0 : index
    %c0_89 = arith.constant 0 : index
    %235 = vector.load %arg2[%c3_86, %c0_87, %c0_88, %c0_89] : memref<6x1x8x128xf32, #tpu.memory_space<vmem>>, vector<1x1x8x128xf32>
    %236 = vector.shape_cast %235 : vector<1x1x8x128xf32> to vector<8x128xf32>
    %237 = arith.subf %236, %189 : vector<8x128xf32>
    %238 = arith.subf %237, %141 : vector<8x128xf32>
    %239 = arith.subf %238, %215 : vector<8x128xf32>
    %c4_90 = arith.constant 4 : index
    %c0_91 = arith.constant 0 : index
    %c0_92 = arith.constant 0 : index
    %c0_93 = arith.constant 0 : index
    %240 = vector.load %arg2[%c4_90, %c0_91, %c0_92, %c0_93] : memref<6x1x8x128xf32, #tpu.memory_space<vmem>>, vector<1x1x8x128xf32>
    %241 = vector.shape_cast %240 : vector<1x1x8x128xf32> to vector<8x128xf32>
    %242 = arith.subf %241, %198 : vector<8x128xf32>
    %243 = arith.subf %242, %147 : vector<8x128xf32>
    %244 = arith.subf %243, %219 : vector<8x128xf32>
    %c5_94 = arith.constant 5 : index
    %c0_95 = arith.constant 0 : index
    %c0_96 = arith.constant 0 : index
    %c0_97 = arith.constant 0 : index
    %245 = vector.load %arg2[%c5_94, %c0_95, %c0_96, %c0_97] : memref<6x1x8x128xf32, #tpu.memory_space<vmem>>, vector<1x1x8x128xf32>
    %246 = vector.shape_cast %245 : vector<1x1x8x128xf32> to vector<8x128xf32>
    %247 = arith.subf %246, %207 : vector<8x128xf32>
    %248 = arith.subf %247, %153 : vector<8x128xf32>
    %cst_98 = arith.constant 0.00999999977 : f32
    %249 = vector.broadcast %cst_98 : f32 to vector<8x128xf32>
    %250 = arith.mulf %249, %224 : vector<8x128xf32>
    %cst_99 = arith.constant 0.00999999977 : f32
    %251 = vector.broadcast %cst_99 : f32 to vector<8x128xf32>
    %252 = arith.mulf %251, %229 : vector<8x128xf32>
    %cst_100 = arith.constant 0.00999999977 : f32
    %253 = vector.broadcast %cst_100 : f32 to vector<8x128xf32>
    %254 = arith.mulf %253, %234 : vector<8x128xf32>
    %cst_101 = arith.constant 0.00999999977 : f32
    %255 = vector.broadcast %cst_101 : f32 to vector<8x128xf32>
    %256 = arith.mulf %255, %239 : vector<8x128xf32>
    %cst_102 = arith.constant 0.00999999977 : f32
    %257 = vector.broadcast %cst_102 : f32 to vector<8x128xf32>
    %258 = arith.mulf %257, %244 : vector<8x128xf32>
    %cst_103 = arith.constant 0.00999999977 : f32
    %259 = vector.broadcast %cst_103 : f32 to vector<8x128xf32>
    %260 = arith.mulf %259, %248 : vector<8x128xf32>
    %cst_104 = arith.constant 1.000000e-01 : f32
    %261 = vector.broadcast %cst_104 : f32 to vector<8x128xf32>
    %262 = arith.mulf %261, %94 : vector<8x128xf32>
    %263 = arith.addf %1, %262 : vector<8x128xf32>
    %cst_105 = arith.constant 1.000000e-01 : f32
    %264 = vector.broadcast %cst_105 : f32 to vector<8x128xf32>
    %265 = arith.mulf %264, %101 : vector<8x128xf32>
    %266 = arith.addf %3, %265 : vector<8x128xf32>
    %cst_106 = arith.constant 1.000000e-01 : f32
    %267 = vector.broadcast %cst_106 : f32 to vector<8x128xf32>
    %268 = arith.mulf %267, %108 : vector<8x128xf32>
    %269 = arith.addf %5, %268 : vector<8x128xf32>
    %cst_107 = arith.constant 1.000000e-01 : f32
    %270 = vector.broadcast %cst_107 : f32 to vector<8x128xf32>
    %271 = arith.mulf %270, %117 : vector<8x128xf32>
    %272 = arith.addf %7, %271 : vector<8x128xf32>
    %cst_108 = arith.constant 1.000000e-01 : f32
    %273 = vector.broadcast %cst_108 : f32 to vector<8x128xf32>
    %274 = arith.mulf %273, %250 : vector<8x128xf32>
    %275 = arith.addf %9, %274 : vector<8x128xf32>
    %cst_109 = arith.constant 1.000000e-01 : f32
    %276 = vector.broadcast %cst_109 : f32 to vector<8x128xf32>
    %277 = arith.mulf %276, %252 : vector<8x128xf32>
    %278 = arith.addf %11, %277 : vector<8x128xf32>
    %cst_110 = arith.constant 1.000000e-01 : f32
    %279 = vector.broadcast %cst_110 : f32 to vector<8x128xf32>
    %280 = arith.mulf %279, %254 : vector<8x128xf32>
    %281 = arith.addf %13, %280 : vector<8x128xf32>
    %cst_111 = arith.constant 1.000000e-01 : f32
    %282 = vector.broadcast %cst_111 : f32 to vector<8x128xf32>
    %283 = arith.mulf %282, %256 : vector<8x128xf32>
    %284 = arith.addf %15, %283 : vector<8x128xf32>
    %cst_112 = arith.constant 1.000000e-01 : f32
    %285 = vector.broadcast %cst_112 : f32 to vector<8x128xf32>
    %286 = arith.mulf %285, %258 : vector<8x128xf32>
    %287 = arith.addf %17, %286 : vector<8x128xf32>
    %cst_113 = arith.constant 1.000000e-01 : f32
    %288 = vector.broadcast %cst_113 : f32 to vector<8x128xf32>
    %289 = arith.mulf %288, %260 : vector<8x128xf32>
    %290 = arith.addf %19, %289 : vector<8x128xf32>
    %cst_114 = arith.constant 5.000000e-02 : f32
    %291 = vector.broadcast %cst_114 : f32 to vector<8x128xf32>
    %292 = arith.mulf %291, %75 : vector<8x128xf32>
    %cst_115 = arith.constant 5.000000e-02 : f32
    %293 = vector.broadcast %cst_115 : f32 to vector<8x128xf32>
    %294 = arith.mulf %293, %80 : vector<8x128xf32>
    %cst_116 = arith.constant 5.000000e-02 : f32
    %295 = vector.broadcast %cst_116 : f32 to vector<8x128xf32>
    %296 = arith.mulf %295, %85 : vector<8x128xf32>
    %cst_117 = arith.constant 5.000000e-02 : f32
    %297 = vector.broadcast %cst_117 : f32 to vector<8x128xf32>
    %298 = arith.mulf %297, %94 : vector<8x128xf32>
    %cst_118 = arith.constant 5.000000e-02 : f32
    %299 = vector.broadcast %cst_118 : f32 to vector<8x128xf32>
    %300 = arith.mulf %299, %101 : vector<8x128xf32>
    %cst_119 = arith.constant 5.000000e-02 : f32
    %301 = vector.broadcast %cst_119 : f32 to vector<8x128xf32>
    %302 = arith.mulf %301, %108 : vector<8x128xf32>
    %cst_120 = arith.constant 5.000000e-02 : f32
    %303 = vector.broadcast %cst_120 : f32 to vector<8x128xf32>
    %304 = arith.mulf %303, %117 : vector<8x128xf32>
    %cst_121 = arith.constant 5.000000e-02 : f32
    %305 = vector.broadcast %cst_121 : f32 to vector<8x128xf32>
    %306 = arith.mulf %305, %250 : vector<8x128xf32>
    %cst_122 = arith.constant 5.000000e-02 : f32
    %307 = vector.broadcast %cst_122 : f32 to vector<8x128xf32>
    %308 = arith.mulf %307, %252 : vector<8x128xf32>
    %cst_123 = arith.constant 5.000000e-02 : f32
    %309 = vector.broadcast %cst_123 : f32 to vector<8x128xf32>
    %310 = arith.mulf %309, %254 : vector<8x128xf32>
    %cst_124 = arith.constant 5.000000e-02 : f32
    %311 = vector.broadcast %cst_124 : f32 to vector<8x128xf32>
    %312 = arith.mulf %311, %256 : vector<8x128xf32>
    %cst_125 = arith.constant 5.000000e-02 : f32
    %313 = vector.broadcast %cst_125 : f32 to vector<8x128xf32>
    %314 = arith.mulf %313, %258 : vector<8x128xf32>
    %cst_126 = arith.constant 5.000000e-02 : f32
    %315 = vector.broadcast %cst_126 : f32 to vector<8x128xf32>
    %316 = arith.mulf %315, %260 : vector<8x128xf32>
    %317 = arith.addf %298, %1 : vector<8x128xf32>
    %318 = arith.addf %300, %3 : vector<8x128xf32>
    %319 = arith.addf %302, %5 : vector<8x128xf32>
    %320 = arith.addf %304, %7 : vector<8x128xf32>
    %321 = arith.addf %306, %9 : vector<8x128xf32>
    %322 = arith.addf %308, %11 : vector<8x128xf32>
    %323 = arith.addf %310, %13 : vector<8x128xf32>
    %324 = arith.addf %312, %15 : vector<8x128xf32>
    %325 = arith.addf %314, %17 : vector<8x128xf32>
    %326 = arith.addf %316, %19 : vector<8x128xf32>
    %327 = arith.mulf %266, %266 : vector<8x128xf32>
    %328 = arith.mulf %269, %269 : vector<8x128xf32>
    %329 = arith.addf %327, %328 : vector<8x128xf32>
    %cst_127 = arith.constant 2.000000e+00 : f32
    %330 = vector.broadcast %cst_127 : f32 to vector<8x128xf32>
    %331 = arith.mulf %330, %329 : vector<8x128xf32>
    %cst_128 = arith.constant 1.000000e+00 : f32
    %332 = vector.broadcast %cst_128 : f32 to vector<8x128xf32>
    %333 = arith.subf %332, %331 : vector<8x128xf32>
    %334 = arith.mulf %263, %266 : vector<8x128xf32>
    %335 = arith.mulf %269, %272 : vector<8x128xf32>
    %336 = arith.subf %334, %335 : vector<8x128xf32>
    %cst_129 = arith.constant 2.000000e+00 : f32
    %337 = vector.broadcast %cst_129 : f32 to vector<8x128xf32>
    %338 = arith.mulf %337, %336 : vector<8x128xf32>
    %339 = arith.mulf %263, %269 : vector<8x128xf32>
    %340 = arith.mulf %266, %272 : vector<8x128xf32>
    %341 = arith.addf %339, %340 : vector<8x128xf32>
    %cst_130 = arith.constant 2.000000e+00 : f32
    %342 = vector.broadcast %cst_130 : f32 to vector<8x128xf32>
    %343 = arith.mulf %342, %341 : vector<8x128xf32>
    %344 = arith.mulf %263, %266 : vector<8x128xf32>
    %345 = arith.mulf %269, %272 : vector<8x128xf32>
    %346 = arith.addf %344, %345 : vector<8x128xf32>
    %cst_131 = arith.constant 2.000000e+00 : f32
    %347 = vector.broadcast %cst_131 : f32 to vector<8x128xf32>
    %348 = arith.mulf %347, %346 : vector<8x128xf32>
    %349 = arith.mulf %263, %263 : vector<8x128xf32>
    %350 = arith.mulf %269, %269 : vector<8x128xf32>
    %351 = arith.addf %349, %350 : vector<8x128xf32>
    %cst_132 = arith.constant 2.000000e+00 : f32
    %352 = vector.broadcast %cst_132 : f32 to vector<8x128xf32>
    %353 = arith.mulf %352, %351 : vector<8x128xf32>
    %cst_133 = arith.constant 1.000000e+00 : f32
    %354 = vector.broadcast %cst_133 : f32 to vector<8x128xf32>
    %355 = arith.subf %354, %353 : vector<8x128xf32>
    %356 = arith.mulf %266, %269 : vector<8x128xf32>
    %357 = arith.mulf %263, %272 : vector<8x128xf32>
    %358 = arith.subf %356, %357 : vector<8x128xf32>
    %cst_134 = arith.constant 2.000000e+00 : f32
    %359 = vector.broadcast %cst_134 : f32 to vector<8x128xf32>
    %360 = arith.mulf %359, %358 : vector<8x128xf32>
    %361 = arith.mulf %263, %269 : vector<8x128xf32>
    %362 = arith.mulf %266, %272 : vector<8x128xf32>
    %363 = arith.subf %361, %362 : vector<8x128xf32>
    %cst_135 = arith.constant 2.000000e+00 : f32
    %364 = vector.broadcast %cst_135 : f32 to vector<8x128xf32>
    %365 = arith.mulf %364, %363 : vector<8x128xf32>
    %366 = arith.mulf %266, %269 : vector<8x128xf32>
    %367 = arith.mulf %263, %272 : vector<8x128xf32>
    %368 = arith.addf %366, %367 : vector<8x128xf32>
    %cst_136 = arith.constant 2.000000e+00 : f32
    %369 = vector.broadcast %cst_136 : f32 to vector<8x128xf32>
    %370 = arith.mulf %369, %368 : vector<8x128xf32>
    %371 = arith.mulf %263, %263 : vector<8x128xf32>
    %372 = arith.mulf %266, %266 : vector<8x128xf32>
    %373 = arith.addf %371, %372 : vector<8x128xf32>
    %cst_137 = arith.constant 2.000000e+00 : f32
    %374 = vector.broadcast %cst_137 : f32 to vector<8x128xf32>
    %375 = arith.mulf %374, %373 : vector<8x128xf32>
    %cst_138 = arith.constant 1.000000e+00 : f32
    %376 = vector.broadcast %cst_138 : f32 to vector<8x128xf32>
    %377 = arith.subf %376, %375 : vector<8x128xf32>
    %378 = arith.mulf %333, %275 : vector<8x128xf32>
    %379 = arith.mulf %338, %278 : vector<8x128xf32>
    %380 = arith.addf %378, %379 : vector<8x128xf32>
    %381 = arith.mulf %343, %281 : vector<8x128xf32>
    %382 = arith.addf %380, %381 : vector<8x128xf32>
    %383 = arith.mulf %348, %275 : vector<8x128xf32>
    %384 = arith.mulf %355, %278 : vector<8x128xf32>
    %385 = arith.addf %383, %384 : vector<8x128xf32>
    %386 = arith.mulf %360, %281 : vector<8x128xf32>
    %387 = arith.addf %385, %386 : vector<8x128xf32>
    %388 = arith.mulf %365, %275 : vector<8x128xf32>
    %389 = arith.mulf %370, %278 : vector<8x128xf32>
    %390 = arith.addf %388, %389 : vector<8x128xf32>
    %391 = arith.mulf %377, %281 : vector<8x128xf32>
    %392 = arith.addf %390, %391 : vector<8x128xf32>
    %cst_139 = arith.constant 0.000000e+00 : f32
    %393 = vector.broadcast %cst_139 : f32 to vector<8x128xf32>
    %394 = arith.subf %393, %263 : vector<8x128xf32>
    %395 = arith.mulf %394, %284 : vector<8x128xf32>
    %396 = arith.mulf %266, %287 : vector<8x128xf32>
    %397 = arith.subf %395, %396 : vector<8x128xf32>
    %398 = arith.mulf %269, %290 : vector<8x128xf32>
    %399 = arith.subf %397, %398 : vector<8x128xf32>
    %cst_140 = arith.constant 5.000000e-01 : f32
    %400 = vector.broadcast %cst_140 : f32 to vector<8x128xf32>
    %401 = arith.mulf %400, %399 : vector<8x128xf32>
    %402 = arith.mulf %272, %284 : vector<8x128xf32>
    %403 = arith.mulf %269, %287 : vector<8x128xf32>
    %404 = arith.subf %402, %403 : vector<8x128xf32>
    %405 = arith.mulf %266, %290 : vector<8x128xf32>
    %406 = arith.addf %404, %405 : vector<8x128xf32>
    %cst_141 = arith.constant 5.000000e-01 : f32
    %407 = vector.broadcast %cst_141 : f32 to vector<8x128xf32>
    %408 = arith.mulf %407, %406 : vector<8x128xf32>
    %409 = arith.mulf %269, %284 : vector<8x128xf32>
    %410 = arith.mulf %272, %287 : vector<8x128xf32>
    %411 = arith.addf %409, %410 : vector<8x128xf32>
    %412 = arith.mulf %263, %290 : vector<8x128xf32>
    %413 = arith.subf %411, %412 : vector<8x128xf32>
    %cst_142 = arith.constant 5.000000e-01 : f32
    %414 = vector.broadcast %cst_142 : f32 to vector<8x128xf32>
    %415 = arith.mulf %414, %413 : vector<8x128xf32>
    %cst_143 = arith.constant 0.000000e+00 : f32
    %416 = vector.broadcast %cst_143 : f32 to vector<8x128xf32>
    %417 = arith.subf %416, %266 : vector<8x128xf32>
    %418 = arith.mulf %417, %284 : vector<8x128xf32>
    %419 = arith.mulf %263, %287 : vector<8x128xf32>
    %420 = arith.addf %418, %419 : vector<8x128xf32>
    %421 = arith.mulf %272, %290 : vector<8x128xf32>
    %422 = arith.addf %420, %421 : vector<8x128xf32>
    %cst_144 = arith.constant 5.000000e-01 : f32
    %423 = vector.broadcast %cst_144 : f32 to vector<8x128xf32>
    %424 = arith.mulf %423, %422 : vector<8x128xf32>
    %425 = math.absf %275 : vector<8x128xf32>
    %cst_145 = arith.constant -7.400000e+02 : f32
    %426 = vector.broadcast %cst_145 : f32 to vector<8x128xf32>
    %427 = arith.mulf %426, %425 : vector<8x128xf32>
    %cst_146 = arith.constant 7.000000e+01 : f32
    %428 = vector.broadcast %cst_146 : f32 to vector<8x128xf32>
    %429 = arith.subf %428, %427 : vector<8x128xf32>
    %430 = arith.mulf %429, %275 : vector<8x128xf32>
    %431 = math.absf %278 : vector<8x128xf32>
    %cst_147 = arith.constant -9.900000e+02 : f32
    %432 = vector.broadcast %cst_147 : f32 to vector<8x128xf32>
    %433 = arith.mulf %432, %431 : vector<8x128xf32>
    %cst_148 = arith.constant 7.000000e+01 : f32
    %434 = vector.broadcast %cst_148 : f32 to vector<8x128xf32>
    %435 = arith.subf %434, %433 : vector<8x128xf32>
    %436 = arith.mulf %435, %278 : vector<8x128xf32>
    %437 = math.absf %281 : vector<8x128xf32>
    %cst_149 = arith.constant -1.800000e+03 : f32
    %438 = vector.broadcast %cst_149 : f32 to vector<8x128xf32>
    %439 = arith.mulf %438, %437 : vector<8x128xf32>
    %cst_150 = arith.constant 7.000000e+02 : f32
    %440 = vector.broadcast %cst_150 : f32 to vector<8x128xf32>
    %441 = arith.subf %440, %439 : vector<8x128xf32>
    %442 = arith.mulf %441, %281 : vector<8x128xf32>
    %443 = math.absf %284 : vector<8x128xf32>
    %cst_151 = arith.constant -6.700000e+02 : f32
    %444 = vector.broadcast %cst_151 : f32 to vector<8x128xf32>
    %445 = arith.mulf %444, %443 : vector<8x128xf32>
    %cst_152 = arith.constant 3.000000e+02 : f32
    %446 = vector.broadcast %cst_152 : f32 to vector<8x128xf32>
    %447 = arith.subf %446, %445 : vector<8x128xf32>
    %448 = arith.mulf %447, %284 : vector<8x128xf32>
    %449 = math.absf %287 : vector<8x128xf32>
    %cst_153 = arith.constant -7.700000e+02 : f32
    %450 = vector.broadcast %cst_153 : f32 to vector<8x128xf32>
    %451 = arith.mulf %450, %449 : vector<8x128xf32>
    %cst_154 = arith.constant 3.000000e+02 : f32
    %452 = vector.broadcast %cst_154 : f32 to vector<8x128xf32>
    %453 = arith.subf %452, %451 : vector<8x128xf32>
    %454 = arith.mulf %453, %287 : vector<8x128xf32>
    %455 = math.absf %290 : vector<8x128xf32>
    %cst_155 = arith.constant -5.200000e+02 : f32
    %456 = vector.broadcast %cst_155 : f32 to vector<8x128xf32>
    %457 = arith.mulf %456, %455 : vector<8x128xf32>
    %cst_156 = arith.constant 1.000000e+02 : f32
    %458 = vector.broadcast %cst_156 : f32 to vector<8x128xf32>
    %459 = arith.subf %458, %457 : vector<8x128xf32>
    %460 = arith.mulf %459, %290 : vector<8x128xf32>
    %cst_157 = arith.constant 1.000000e+02 : f32
    %461 = vector.broadcast %cst_157 : f32 to vector<8x128xf32>
    %462 = arith.mulf %461, %275 : vector<8x128xf32>
    %cst_158 = arith.constant 1.000000e+02 : f32
    %463 = vector.broadcast %cst_158 : f32 to vector<8x128xf32>
    %464 = arith.mulf %463, %278 : vector<8x128xf32>
    %cst_159 = arith.constant 1.000000e+02 : f32
    %465 = vector.broadcast %cst_159 : f32 to vector<8x128xf32>
    %466 = arith.mulf %465, %281 : vector<8x128xf32>
    %cst_160 = arith.constant 1.000000e+02 : f32
    %467 = vector.broadcast %cst_160 : f32 to vector<8x128xf32>
    %468 = arith.mulf %467, %284 : vector<8x128xf32>
    %cst_161 = arith.constant 1.000000e+02 : f32
    %469 = vector.broadcast %cst_161 : f32 to vector<8x128xf32>
    %470 = arith.mulf %469, %287 : vector<8x128xf32>
    %cst_162 = arith.constant 1.000000e+02 : f32
    %471 = vector.broadcast %cst_162 : f32 to vector<8x128xf32>
    %472 = arith.mulf %471, %290 : vector<8x128xf32>
    %473 = arith.mulf %464, %290 : vector<8x128xf32>
    %474 = arith.mulf %466, %287 : vector<8x128xf32>
    %475 = arith.subf %473, %474 : vector<8x128xf32>
    %cst_163 = arith.constant 0.000000e+00 : f32
    %476 = vector.broadcast %cst_163 : f32 to vector<8x128xf32>
    %477 = arith.subf %476, %475 : vector<8x128xf32>
    %478 = arith.mulf %466, %284 : vector<8x128xf32>
    %479 = arith.mulf %462, %290 : vector<8x128xf32>
    %480 = arith.subf %478, %479 : vector<8x128xf32>
    %cst_164 = arith.constant 0.000000e+00 : f32
    %481 = vector.broadcast %cst_164 : f32 to vector<8x128xf32>
    %482 = arith.subf %481, %480 : vector<8x128xf32>
    %483 = arith.mulf %462, %287 : vector<8x128xf32>
    %484 = arith.mulf %464, %284 : vector<8x128xf32>
    %485 = arith.subf %483, %484 : vector<8x128xf32>
    %cst_165 = arith.constant 0.000000e+00 : f32
    %486 = vector.broadcast %cst_165 : f32 to vector<8x128xf32>
    %487 = arith.subf %486, %485 : vector<8x128xf32>
    %488 = arith.mulf %464, %281 : vector<8x128xf32>
    %489 = arith.mulf %466, %278 : vector<8x128xf32>
    %490 = arith.subf %488, %489 : vector<8x128xf32>
    %cst_166 = arith.constant 0.000000e+00 : f32
    %491 = vector.broadcast %cst_166 : f32 to vector<8x128xf32>
    %492 = arith.subf %491, %490 : vector<8x128xf32>
    %493 = arith.mulf %470, %290 : vector<8x128xf32>
    %494 = arith.mulf %472, %287 : vector<8x128xf32>
    %495 = arith.subf %493, %494 : vector<8x128xf32>
    %496 = arith.subf %492, %495 : vector<8x128xf32>
    %497 = arith.mulf %466, %275 : vector<8x128xf32>
    %498 = arith.mulf %462, %281 : vector<8x128xf32>
    %499 = arith.subf %497, %498 : vector<8x128xf32>
    %cst_167 = arith.constant 0.000000e+00 : f32
    %500 = vector.broadcast %cst_167 : f32 to vector<8x128xf32>
    %501 = arith.subf %500, %499 : vector<8x128xf32>
    %502 = arith.mulf %472, %284 : vector<8x128xf32>
    %503 = arith.mulf %468, %290 : vector<8x128xf32>
    %504 = arith.subf %502, %503 : vector<8x128xf32>
    %505 = arith.subf %501, %504 : vector<8x128xf32>
    %506 = arith.mulf %462, %278 : vector<8x128xf32>
    %507 = arith.mulf %464, %275 : vector<8x128xf32>
    %508 = arith.subf %506, %507 : vector<8x128xf32>
    %cst_168 = arith.constant 0.000000e+00 : f32
    %509 = vector.broadcast %cst_168 : f32 to vector<8x128xf32>
    %510 = arith.subf %509, %508 : vector<8x128xf32>
    %511 = arith.mulf %468, %287 : vector<8x128xf32>
    %512 = arith.mulf %470, %284 : vector<8x128xf32>
    %513 = arith.subf %511, %512 : vector<8x128xf32>
    %514 = arith.subf %510, %513 : vector<8x128xf32>
    %cst_169 = arith.constant -9103.67968 : f32
    %515 = vector.broadcast %cst_169 : f32 to vector<8x128xf32>
    %516 = arith.mulf %515, %365 : vector<8x128xf32>
    %cst_170 = arith.constant -9103.67968 : f32
    %517 = vector.broadcast %cst_170 : f32 to vector<8x128xf32>
    %518 = arith.mulf %517, %370 : vector<8x128xf32>
    %cst_171 = arith.constant -9103.67968 : f32
    %519 = vector.broadcast %cst_171 : f32 to vector<8x128xf32>
    %520 = arith.mulf %519, %377 : vector<8x128xf32>
    %cst_172 = arith.constant 2016.93604 : f32
    %521 = vector.broadcast %cst_172 : f32 to vector<8x128xf32>
    %522 = arith.mulf %521, %370 : vector<8x128xf32>
    %cst_173 = arith.constant 2016.93604 : f32
    %523 = vector.broadcast %cst_173 : f32 to vector<8x128xf32>
    %524 = arith.mulf %523, %365 : vector<8x128xf32>
    %cst_174 = arith.constant 0.000000e+00 : f32
    %525 = vector.broadcast %cst_174 : f32 to vector<8x128xf32>
    %526 = arith.subf %525, %524 : vector<8x128xf32>
    %c0_175 = arith.constant 0 : index
    %c0_176 = arith.constant 0 : index
    %c0_177 = arith.constant 0 : index
    %c0_178 = arith.constant 0 : index
    %527 = vector.load %arg2[%c0_175, %c0_176, %c0_177, %c0_178] : memref<6x1x8x128xf32, #tpu.memory_space<vmem>>, vector<1x1x8x128xf32>
    %528 = vector.shape_cast %527 : vector<1x1x8x128xf32> to vector<8x128xf32>
    %529 = arith.subf %528, %477 : vector<8x128xf32>
    %530 = arith.subf %529, %430 : vector<8x128xf32>
    %531 = arith.subf %530, %516 : vector<8x128xf32>
    %c1_179 = arith.constant 1 : index
    %c0_180 = arith.constant 0 : index
    %c0_181 = arith.constant 0 : index
    %c0_182 = arith.constant 0 : index
    %532 = vector.load %arg2[%c1_179, %c0_180, %c0_181, %c0_182] : memref<6x1x8x128xf32, #tpu.memory_space<vmem>>, vector<1x1x8x128xf32>
    %533 = vector.shape_cast %532 : vector<1x1x8x128xf32> to vector<8x128xf32>
    %534 = arith.subf %533, %482 : vector<8x128xf32>
    %535 = arith.subf %534, %436 : vector<8x128xf32>
    %536 = arith.subf %535, %518 : vector<8x128xf32>
    %c2_183 = arith.constant 2 : index
    %c0_184 = arith.constant 0 : index
    %c0_185 = arith.constant 0 : index
    %c0_186 = arith.constant 0 : index
    %537 = vector.load %arg2[%c2_183, %c0_184, %c0_185, %c0_186] : memref<6x1x8x128xf32, #tpu.memory_space<vmem>>, vector<1x1x8x128xf32>
    %538 = vector.shape_cast %537 : vector<1x1x8x128xf32> to vector<8x128xf32>
    %539 = arith.subf %538, %487 : vector<8x128xf32>
    %540 = arith.subf %539, %442 : vector<8x128xf32>
    %541 = arith.subf %540, %520 : vector<8x128xf32>
    %c3_187 = arith.constant 3 : index
    %c0_188 = arith.constant 0 : index
    %c0_189 = arith.constant 0 : index
    %c0_190 = arith.constant 0 : index
    %542 = vector.load %arg2[%c3_187, %c0_188, %c0_189, %c0_190] : memref<6x1x8x128xf32, #tpu.memory_space<vmem>>, vector<1x1x8x128xf32>
    %543 = vector.shape_cast %542 : vector<1x1x8x128xf32> to vector<8x128xf32>
    %544 = arith.subf %543, %496 : vector<8x128xf32>
    %545 = arith.subf %544, %448 : vector<8x128xf32>
    %546 = arith.subf %545, %522 : vector<8x128xf32>
    %c4_191 = arith.constant 4 : index
    %c0_192 = arith.constant 0 : index
    %c0_193 = arith.constant 0 : index
    %c0_194 = arith.constant 0 : index
    %547 = vector.load %arg2[%c4_191, %c0_192, %c0_193, %c0_194] : memref<6x1x8x128xf32, #tpu.memory_space<vmem>>, vector<1x1x8x128xf32>
    %548 = vector.shape_cast %547 : vector<1x1x8x128xf32> to vector<8x128xf32>
    %549 = arith.subf %548, %505 : vector<8x128xf32>
    %550 = arith.subf %549, %454 : vector<8x128xf32>
    %551 = arith.subf %550, %526 : vector<8x128xf32>
    %c5_195 = arith.constant 5 : index
    %c0_196 = arith.constant 0 : index
    %c0_197 = arith.constant 0 : index
    %c0_198 = arith.constant 0 : index
    %552 = vector.load %arg2[%c5_195, %c0_196, %c0_197, %c0_198] : memref<6x1x8x128xf32, #tpu.memory_space<vmem>>, vector<1x1x8x128xf32>
    %553 = vector.shape_cast %552 : vector<1x1x8x128xf32> to vector<8x128xf32>
    %554 = arith.subf %553, %514 : vector<8x128xf32>
    %555 = arith.subf %554, %460 : vector<8x128xf32>
    %cst_199 = arith.constant 0.00999999977 : f32
    %556 = vector.broadcast %cst_199 : f32 to vector<8x128xf32>
    %557 = arith.mulf %556, %531 : vector<8x128xf32>
    %cst_200 = arith.constant 0.00999999977 : f32
    %558 = vector.broadcast %cst_200 : f32 to vector<8x128xf32>
    %559 = arith.mulf %558, %536 : vector<8x128xf32>
    %cst_201 = arith.constant 0.00999999977 : f32
    %560 = vector.broadcast %cst_201 : f32 to vector<8x128xf32>
    %561 = arith.mulf %560, %541 : vector<8x128xf32>
    %cst_202 = arith.constant 0.00999999977 : f32
    %562 = vector.broadcast %cst_202 : f32 to vector<8x128xf32>
    %563 = arith.mulf %562, %546 : vector<8x128xf32>
    %cst_203 = arith.constant 0.00999999977 : f32
    %564 = vector.broadcast %cst_203 : f32 to vector<8x128xf32>
    %565 = arith.mulf %564, %551 : vector<8x128xf32>
    %cst_204 = arith.constant 0.00999999977 : f32
    %566 = vector.broadcast %cst_204 : f32 to vector<8x128xf32>
    %567 = arith.mulf %566, %555 : vector<8x128xf32>
    %c0_205 = arith.constant 0 : index
    %c0_206 = arith.constant 0 : index
    %c0_207 = arith.constant 0 : index
    %c0_208 = arith.constant 0 : index
    %568 = vector.load %arg1[%c0_205, %c0_206, %c0_207, %c0_208] : memref<13x1x8x128xf32, #tpu.memory_space<vmem>>, vector<1x1x8x128xf32>
    %569 = vector.shape_cast %568 : vector<1x1x8x128xf32> to vector<8x128xf32>
    %cst_209 = arith.constant 5.000000e-02 : f32
    %570 = vector.broadcast %cst_209 : f32 to vector<8x128xf32>
    %571 = arith.mulf %570, %382 : vector<8x128xf32>
    %572 = arith.addf %292, %571 : vector<8x128xf32>
    %573 = arith.addf %569, %572 : vector<8x128xf32>
    %c1_210 = arith.constant 1 : index
    %c0_211 = arith.constant 0 : index
    %c0_212 = arith.constant 0 : index
    %c0_213 = arith.constant 0 : index
    %574 = vector.load %arg1[%c1_210, %c0_211, %c0_212, %c0_213] : memref<13x1x8x128xf32, #tpu.memory_space<vmem>>, vector<1x1x8x128xf32>
    %575 = vector.shape_cast %574 : vector<1x1x8x128xf32> to vector<8x128xf32>
    %cst_214 = arith.constant 5.000000e-02 : f32
    %576 = vector.broadcast %cst_214 : f32 to vector<8x128xf32>
    %577 = arith.mulf %576, %387 : vector<8x128xf32>
    %578 = arith.addf %294, %577 : vector<8x128xf32>
    %579 = arith.addf %575, %578 : vector<8x128xf32>
    %c2_215 = arith.constant 2 : index
    %c0_216 = arith.constant 0 : index
    %c0_217 = arith.constant 0 : index
    %c0_218 = arith.constant 0 : index
    %580 = vector.load %arg1[%c2_215, %c0_216, %c0_217, %c0_218] : memref<13x1x8x128xf32, #tpu.memory_space<vmem>>, vector<1x1x8x128xf32>
    %581 = vector.shape_cast %580 : vector<1x1x8x128xf32> to vector<8x128xf32>
    %cst_219 = arith.constant 5.000000e-02 : f32
    %582 = vector.broadcast %cst_219 : f32 to vector<8x128xf32>
    %583 = arith.mulf %582, %392 : vector<8x128xf32>
    %584 = arith.addf %296, %583 : vector<8x128xf32>
    %585 = arith.addf %581, %584 : vector<8x128xf32>
    %cst_220 = arith.constant 5.000000e-02 : f32
    %586 = vector.broadcast %cst_220 : f32 to vector<8x128xf32>
    %587 = arith.mulf %586, %401 : vector<8x128xf32>
    %588 = arith.addf %317, %587 : vector<8x128xf32>
    %cst_221 = arith.constant 5.000000e-02 : f32
    %589 = vector.broadcast %cst_221 : f32 to vector<8x128xf32>
    %590 = arith.mulf %589, %408 : vector<8x128xf32>
    %591 = arith.addf %318, %590 : vector<8x128xf32>
    %cst_222 = arith.constant 5.000000e-02 : f32
    %592 = vector.broadcast %cst_222 : f32 to vector<8x128xf32>
    %593 = arith.mulf %592, %415 : vector<8x128xf32>
    %594 = arith.addf %319, %593 : vector<8x128xf32>
    %cst_223 = arith.constant 5.000000e-02 : f32
    %595 = vector.broadcast %cst_223 : f32 to vector<8x128xf32>
    %596 = arith.mulf %595, %424 : vector<8x128xf32>
    %597 = arith.addf %320, %596 : vector<8x128xf32>
    %cst_224 = arith.constant 5.000000e-02 : f32
    %598 = vector.broadcast %cst_224 : f32 to vector<8x128xf32>
    %599 = arith.mulf %598, %557 : vector<8x128xf32>
    %600 = arith.addf %321, %599 : vector<8x128xf32>
    %cst_225 = arith.constant 5.000000e-02 : f32
    %601 = vector.broadcast %cst_225 : f32 to vector<8x128xf32>
    %602 = arith.mulf %601, %559 : vector<8x128xf32>
    %603 = arith.addf %322, %602 : vector<8x128xf32>
    %cst_226 = arith.constant 5.000000e-02 : f32
    %604 = vector.broadcast %cst_226 : f32 to vector<8x128xf32>
    %605 = arith.mulf %604, %561 : vector<8x128xf32>
    %606 = arith.addf %323, %605 : vector<8x128xf32>
    %cst_227 = arith.constant 5.000000e-02 : f32
    %607 = vector.broadcast %cst_227 : f32 to vector<8x128xf32>
    %608 = arith.mulf %607, %563 : vector<8x128xf32>
    %609 = arith.addf %324, %608 : vector<8x128xf32>
    %cst_228 = arith.constant 5.000000e-02 : f32
    %610 = vector.broadcast %cst_228 : f32 to vector<8x128xf32>
    %611 = arith.mulf %610, %565 : vector<8x128xf32>
    %612 = arith.addf %325, %611 : vector<8x128xf32>
    %cst_229 = arith.constant 5.000000e-02 : f32
    %613 = vector.broadcast %cst_229 : f32 to vector<8x128xf32>
    %614 = arith.mulf %613, %567 : vector<8x128xf32>
    %615 = arith.addf %326, %614 : vector<8x128xf32>
    %616 = arith.mulf %588, %588 : vector<8x128xf32>
    %617 = arith.mulf %591, %591 : vector<8x128xf32>
    %618 = arith.addf %616, %617 : vector<8x128xf32>
    %619 = arith.mulf %594, %594 : vector<8x128xf32>
    %620 = arith.addf %618, %619 : vector<8x128xf32>
    %621 = arith.mulf %597, %597 : vector<8x128xf32>
    %622 = arith.addf %620, %621 : vector<8x128xf32>
    %623 = math.rsqrt %622 : vector<8x128xf32>
    %c0_230 = arith.constant 0 : index
    %c0_231 = arith.constant 0 : index
    %c0_232 = arith.constant 0 : index
    %c0_233 = arith.constant 0 : index
    %624 = vector.load %arg3[%c0_230, %c0_231, %c0_232, %c0_233] : memref<13x1x8x128xf32, #tpu.memory_space<vmem>>, vector<1x1x8x128xf32>
    %625 = vector.shape_cast %624 : vector<1x1x8x128xf32> to vector<8x128xf32>
    %626 = vector.shape_cast %573 : vector<8x128xf32> to vector<1x1x8x128xf32>
    tpu.vector_store %arg3[%c0_230, %c0_231, %c0_232, %c0_233], %626 {strides = array<i32>} : memref<13x1x8x128xf32, #tpu.memory_space<vmem>>, vector<1x1x8x128xf32>,
    %c1_234 = arith.constant 1 : index
    %c0_235 = arith.constant 0 : index
    %c0_236 = arith.constant 0 : index
    %c0_237 = arith.constant 0 : index
    %627 = vector.load %arg3[%c1_234, %c0_235, %c0_236, %c0_237] : memref<13x1x8x128xf32, #tpu.memory_space<vmem>>, vector<1x1x8x128xf32>
    %628 = vector.shape_cast %627 : vector<1x1x8x128xf32> to vector<8x128xf32>
    %629 = vector.shape_cast %579 : vector<8x128xf32> to vector<1x1x8x128xf32>
    tpu.vector_store %arg3[%c1_234, %c0_235, %c0_236, %c0_237], %629 {strides = array<i32>} : memref<13x1x8x128xf32, #tpu.memory_space<vmem>>, vector<1x1x8x128xf32>,
    %c2_238 = arith.constant 2 : index
    %c0_239 = arith.constant 0 : index
    %c0_240 = arith.constant 0 : index
    %c0_241 = arith.constant 0 : index
    %630 = vector.load %arg3[%c2_238, %c0_239, %c0_240, %c0_241] : memref<13x1x8x128xf32, #tpu.memory_space<vmem>>, vector<1x1x8x128xf32>
    %631 = vector.shape_cast %630 : vector<1x1x8x128xf32> to vector<8x128xf32>
    %632 = vector.shape_cast %585 : vector<8x128xf32> to vector<1x1x8x128xf32>
    tpu.vector_store %arg3[%c2_238, %c0_239, %c0_240, %c0_241], %632 {strides = array<i32>} : memref<13x1x8x128xf32, #tpu.memory_space<vmem>>, vector<1x1x8x128xf32>,
    %633 = arith.mulf %588, %623 : vector<8x128xf32>
    %c3_242 = arith.constant 3 : index
    %c0_243 = arith.constant 0 : index
    %c0_244 = arith.constant 0 : index
    %c0_245 = arith.constant 0 : index
    %634 = vector.load %arg3[%c3_242, %c0_243, %c0_244, %c0_245] : memref<13x1x8x128xf32, #tpu.memory_space<vmem>>, vector<1x1x8x128xf32>
    %635 = vector.shape_cast %634 : vector<1x1x8x128xf32> to vector<8x128xf32>
    %636 = vector.shape_cast %633 : vector<8x128xf32> to vector<1x1x8x128xf32>
    tpu.vector_store %arg3[%c3_242, %c0_243, %c0_244, %c0_245], %636 {strides = array<i32>} : memref<13x1x8x128xf32, #tpu.memory_space<vmem>>, vector<1x1x8x128xf32>,
    %637 = arith.mulf %591, %623 : vector<8x128xf32>
    %c4_246 = arith.constant 4 : index
    %c0_247 = arith.constant 0 : index
    %c0_248 = arith.constant 0 : index
    %c0_249 = arith.constant 0 : index
    %638 = vector.load %arg3[%c4_246, %c0_247, %c0_248, %c0_249] : memref<13x1x8x128xf32, #tpu.memory_space<vmem>>, vector<1x1x8x128xf32>
    %639 = vector.shape_cast %638 : vector<1x1x8x128xf32> to vector<8x128xf32>
    %640 = vector.shape_cast %637 : vector<8x128xf32> to vector<1x1x8x128xf32>
    tpu.vector_store %arg3[%c4_246, %c0_247, %c0_248, %c0_249], %640 {strides = array<i32>} : memref<13x1x8x128xf32, #tpu.memory_space<vmem>>, vector<1x1x8x128xf32>,
    %641 = arith.mulf %594, %623 : vector<8x128xf32>
    %c5_250 = arith.constant 5 : index
    %c0_251 = arith.constant 0 : index
    %c0_252 = arith.constant 0 : index
    %c0_253 = arith.constant 0 : index
    %642 = vector.load %arg3[%c5_250, %c0_251, %c0_252, %c0_253] : memref<13x1x8x128xf32, #tpu.memory_space<vmem>>, vector<1x1x8x128xf32>
    %643 = vector.shape_cast %642 : vector<1x1x8x128xf32> to vector<8x128xf32>
    %644 = vector.shape_cast %641 : vector<8x128xf32> to vector<1x1x8x128xf32>
    tpu.vector_store %arg3[%c5_250, %c0_251, %c0_252, %c0_253], %644 {strides = array<i32>} : memref<13x1x8x128xf32, #tpu.memory_space<vmem>>, vector<1x1x8x128xf32>,
    %645 = arith.mulf %597, %623 : vector<8x128xf32>
    %c6_254 = arith.constant 6 : index
    %c0_255 = arith.constant 0 : index
    %c0_256 = arith.constant 0 : index
    %c0_257 = arith.constant 0 : index
    %646 = vector.load %arg3[%c6_254, %c0_255, %c0_256, %c0_257] : memref<13x1x8x128xf32, #tpu.memory_space<vmem>>, vector<1x1x8x128xf32>
    %647 = vector.shape_cast %646 : vector<1x1x8x128xf32> to vector<8x128xf32>
    %648 = vector.shape_cast %645 : vector<8x128xf32> to vector<1x1x8x128xf32>
    tpu.vector_store %arg3[%c6_254, %c0_255, %c0_256, %c0_257], %648 {strides = array<i32>} : memref<13x1x8x128xf32, #tpu.memory_space<vmem>>, vector<1x1x8x128xf32>,
    %c7_258 = arith.constant 7 : index
    %c0_259 = arith.constant 0 : index
    %c0_260 = arith.constant 0 : index
    %c0_261 = arith.constant 0 : index
    %649 = vector.load %arg3[%c7_258, %c0_259, %c0_260, %c0_261] : memref<13x1x8x128xf32, #tpu.memory_space<vmem>>, vector<1x1x8x128xf32>
    %650 = vector.shape_cast %649 : vector<1x1x8x128xf32> to vector<8x128xf32>
    %651 = vector.shape_cast %600 : vector<8x128xf32> to vector<1x1x8x128xf32>
    tpu.vector_store %arg3[%c7_258, %c0_259, %c0_260, %c0_261], %651 {strides = array<i32>} : memref<13x1x8x128xf32, #tpu.memory_space<vmem>>, vector<1x1x8x128xf32>,
    %c8_262 = arith.constant 8 : index
    %c0_263 = arith.constant 0 : index
    %c0_264 = arith.constant 0 : index
    %c0_265 = arith.constant 0 : index
    %652 = vector.load %arg3[%c8_262, %c0_263, %c0_264, %c0_265] : memref<13x1x8x128xf32, #tpu.memory_space<vmem>>, vector<1x1x8x128xf32>
    %653 = vector.shape_cast %652 : vector<1x1x8x128xf32> to vector<8x128xf32>
    %654 = vector.shape_cast %603 : vector<8x128xf32> to vector<1x1x8x128xf32>
    tpu.vector_store %arg3[%c8_262, %c0_263, %c0_264, %c0_265], %654 {strides = array<i32>} : memref<13x1x8x128xf32, #tpu.memory_space<vmem>>, vector<1x1x8x128xf32>,
    %c9_266 = arith.constant 9 : index
    %c0_267 = arith.constant 0 : index
    %c0_268 = arith.constant 0 : index
    %c0_269 = arith.constant 0 : index
    %655 = vector.load %arg3[%c9_266, %c0_267, %c0_268, %c0_269] : memref<13x1x8x128xf32, #tpu.memory_space<vmem>>, vector<1x1x8x128xf32>
    %656 = vector.shape_cast %655 : vector<1x1x8x128xf32> to vector<8x128xf32>
    %657 = vector.shape_cast %606 : vector<8x128xf32> to vector<1x1x8x128xf32>
    tpu.vector_store %arg3[%c9_266, %c0_267, %c0_268, %c0_269], %657 {strides = array<i32>} : memref<13x1x8x128xf32, #tpu.memory_space<vmem>>, vector<1x1x8x128xf32>,
    %c10_270 = arith.constant 10 : index
    %c0_271 = arith.constant 0 : index
    %c0_272 = arith.constant 0 : index
    %c0_273 = arith.constant 0 : index
    %658 = vector.load %arg3[%c10_270, %c0_271, %c0_272, %c0_273] : memref<13x1x8x128xf32, #tpu.memory_space<vmem>>, vector<1x1x8x128xf32>
    %659 = vector.shape_cast %658 : vector<1x1x8x128xf32> to vector<8x128xf32>
    %660 = vector.shape_cast %609 : vector<8x128xf32> to vector<1x1x8x128xf32>
    tpu.vector_store %arg3[%c10_270, %c0_271, %c0_272, %c0_273], %660 {strides = array<i32>} : memref<13x1x8x128xf32, #tpu.memory_space<vmem>>, vector<1x1x8x128xf32>,
    %c11_274 = arith.constant 11 : index
    %c0_275 = arith.constant 0 : index
    %c0_276 = arith.constant 0 : index
    %c0_277 = arith.constant 0 : index
    %661 = vector.load %arg3[%c11_274, %c0_275, %c0_276, %c0_277] : memref<13x1x8x128xf32, #tpu.memory_space<vmem>>, vector<1x1x8x128xf32>
    %662 = vector.shape_cast %661 : vector<1x1x8x128xf32> to vector<8x128xf32>
    %663 = vector.shape_cast %612 : vector<8x128xf32> to vector<1x1x8x128xf32>
    tpu.vector_store %arg3[%c11_274, %c0_275, %c0_276, %c0_277], %663 {strides = array<i32>} : memref<13x1x8x128xf32, #tpu.memory_space<vmem>>, vector<1x1x8x128xf32>,
    %c12_278 = arith.constant 12 : index
    %c0_279 = arith.constant 0 : index
    %c0_280 = arith.constant 0 : index
    %c0_281 = arith.constant 0 : index
    %664 = vector.load %arg3[%c12_278, %c0_279, %c0_280, %c0_281] : memref<13x1x8x128xf32, #tpu.memory_space<vmem>>, vector<1x1x8x128xf32>
    %665 = vector.shape_cast %664 : vector<1x1x8x128xf32> to vector<8x128xf32>
    %666 = vector.shape_cast %615 : vector<8x128xf32> to vector<1x1x8x128xf32>
    tpu.vector_store %arg3[%c12_278, %c0_279, %c0_280, %c0_281], %666 {strides = array<i32>} : memref<13x1x8x128xf32, #tpu.memory_space<vmem>>, vector<1x1x8x128xf32>,
    return
  }
  func.func @transform_0(%arg0: i32) -> (i32, i32, i32, i32) {
    %c0_i32 = arith.constant 0 : i32
    %c0_i32_0 = arith.constant 0 : i32
    %c0_i32_1 = arith.constant 0 : i32
    %c0_i32_2 = arith.constant 0 : i32
    return %c0_i32, %arg0, %c0_i32_0, %c0_i32_1 : i32, i32, i32, i32
  }
  func.func @transform_1(%arg0: i32) -> (i32, i32, i32, i32) {
    %c0_i32 = arith.constant 0 : i32
    %c0_i32_0 = arith.constant 0 : i32
    %c0_i32_1 = arith.constant 0 : i32
    %c0_i32_2 = arith.constant 0 : i32
    return %c0_i32, %arg0, %c0_i32_0, %c0_i32_1 : i32, i32, i32, i32
  }
  func.func @transform_2(%arg0: i32) -> (i32, i32, i32, i32) {
    %c0_i32 = arith.constant 0 : i32
    %c0_i32_0 = arith.constant 0 : i32
    %c0_i32_1 = arith.constant 0 : i32
    %c0_i32_2 = arith.constant 0 : i32
    return %c0_i32, %arg0, %c0_i32_0, %c0_i32_1 : i32, i32, i32, i32
  }
}

</mosaic_0001>

<bundles_post_ra>
// kernel: forward.1
= control target key start
LH: loop header
LB: loop body
LE: loop exit
PB: predicated region body
PF: predicated region fallthrough
CT: control target
= control target key end

     0   :  { %s1076_s0 = inlined_call_operand.vmem [shape: f32[13,1,8,128], index: 0, kind: input, shape index: {}]   ;;  %s1077_s1 = inlined_call_operand.vmem [shape: f32[6,1,8,128], index: 1, kind: input, shape index: {}]   ;;  %s1078_s2 = inlined_call_operand.vmem [shape: f32[13,1,8,128], index: 2, kind: output, shape index: {}]  }
   0x1   :  { %v550_v0 = vld [vmem:[%s1076_s0 + $0x18] sm:$0xff]  ;;  %v555_v1 = vld [vmem:[%s1076_s0 + $0x20] sm:$0xff]  ;;  %v560_v2 = vld [vmem:[%s1076_s0 + $0x28] sm:$0xff] }
   0x2   :  { %v565_v3 = vld [vmem:[%s1076_s0 + $0x30] sm:$0xff]  ;;  %v31_v4 = vmul.f32 %v555_v1, %v555_v1  ;;  %v571_v5 = vmul.f32 %v560_v2, %v560_v2  ;;  %v575_v6 = vmul.f32 %v555_v1, %v550_v0  ;;  %v40_v7 = vmul.f32 %v560_v2, %v550_v0  ;;  %v582_v8 = vld [vmem:[%s1076_s0 + $0x58] sm:$0xff]  ;;  %v617_v22 = vld [vmem:[%s1076_s0 + $0x60] sm:$0xff] }
   0x3   :  { %v586_v9 = vmul.f32 %v565_v3, %v560_v2  ;;  %v41_v10 = vmul.f32 %v565_v3, %v555_v1  ;;  %v592_v11 = vmul.f32 %v550_v0, %v550_v0  ;;  %v596_v12 = vmul.f32 %v560_v2, %v555_v1  ;;  %v609_v17 = vld [vmem:[%s1076_s0 + $0x50] sm:$0xff]  ;;  %v631_v33 = vld [vmem:[%s1076_s0 + $0x38] sm:$0xff]  ;;  %v636_v34 = vld [vmem:[%s1076_s0 + $0x40] sm:$0xff] }
   0x4   :  { %v33_v13 = vadd.f32 %v571_v5, %v31_v4  ;;  %v601_v14 = vmul.f32 %v565_v3, %v550_v0  ;;  %v76_v15 = vsub.f32 0.0, %v550_v0  ;;  %v78_v16 = vmul.f32 %v582_v8, %v555_v1  ;;  %v653_v42 = vld [vmem:[%s1076_s0 + $0x48] sm:$0xff] }
   0x5   :  { %v38_v18 = vsub.f32 %v575_v6, %v586_v9  ;;  %v42_v19 = vadd.f32 %v41_v10, %v40_v7  ;;  %v54_v20 = vsub.f32 %v40_v7, %v41_v10  ;;  %v58_v21 = vadd.f32 %v592_v11, %v31_v4 }
   0x6   :  { %v34_v23 = vmul.f32 2.0, %v33_v13  ;;  %v56_v24 = vadd.f32 %v601_v14, %v596_v12  ;;  %v77_v25 = vmul.f32 %v609_v17, %v76_v15  ;;  %v80_v28 = vmul.f32 %v617_v22, %v560_v2 }
   0x7   :  { %v39_v26 = vmul.f32 2.0, %v38_v18  ;;  %v43_v27 = vmul.f32 2.0, %v42_v19  ;;  %v624_v30 = vmul.f32 2.0, %v58_v21  ;;  %v83_v32 = vmul.f32 %v609_v17, %v565_v3 }
   0x8   :  { %v35_v29 = vsub.f32 1.0, %v34_v23  ;;  %v79_v31 = vsub.f32 %v77_v25, %v78_v16  ;;  %v638_v35 = vmul.f32 2.0, %v54_v20  ;;  %v640_v36 = vmul.f32 2.0, %v56_v24 }
   0x9   :  { %v84_v37 = vmul.f32 %v582_v8, %v560_v2  ;;  %v62_v39 = vmul.f32 %v636_v34, %v39_v26  ;;  %v86_v40 = vmul.f32 %v617_v22, %v555_v1  ;;  %v89_v41 = vmul.f32 %v609_v17, %v560_v2 }
   0xa   :  { %v61_v38 = vmul.f32 %v631_v33, %v35_v29  ;;  %v90_v44 = vmul.f32 %v582_v8, %v565_v3  ;;  %v92_v45 = vmul.f32 %v617_v22, %v550_v0  ;;  %v95_v46 = vsub.f32 0.0, %v555_v1 }
   0xb   :  { %v85_v43 = vsub.f32 %v83_v32, %v84_v37  ;;  %v1079_v47 = vsub.f32 1.0, %v624_v30  ;;  %v662_v48 = vmul.f32 %v653_v42, %v43_v27  ;;  %v81_v49 = vsub.f32 %v79_v31, %v80_v28 }
   0xc   :  { %v97_v50 = vmul.f32 %v582_v8, %v550_v0  ;;  %v91_v52 = vadd.f32 %v90_v44, %v89_v41  ;;  %v96_v53 = vmul.f32 %v609_v17, %v95_v46  ;;  %v102_v54 = vand.u32 2147483647, %v631_v33 }
   0xd   :  { %v87_v51 = vadd.f32 %v86_v40, %v85_v43  ;;  %v668_v55 = vadd.f32 %v62_v39, %v61_v38  ;;  %v106_v56 = vand.u32 2147483647, %v636_v34  ;;  %v110_v57 = vand.u32 2147483647, %v653_v42 }
   0xe   :  { %v114_v58 = vand.u32 2147483647, %v609_v17  ;;  %v93_v59 = vsub.f32 %v91_v52, %v92_v45  ;;  %v98_v60 = vadd.f32 %v97_v50, %v96_v53  ;;  %v99_v61 = vmul.f32 %v617_v22, %v565_v3 }
   0xf   :  { %v103_v62 = vmul.f32 -740.0, %v102_v54  ;;  %v107_v63 = vmul.f32 -990.0, %v106_v56  ;;  %v111_v4 = vmul.f32 -1800.0, %v110_v57  ;;  %v118_v10 = vand.u32 2147483647, %v582_v8 }
  0x10   :  { %v115_v7 = vmul.f32 -670.0, %v114_v58  ;;  %v676_v13 = vmul.f32 0.5, %v81_v49  ;;  %v678_v15 = vmul.f32 0.5, %v87_v51  ;;  %v122_v18 = vand.u32 2147483647, %v617_v22 }
  0x11   :  { %v104_v16 = vsub.f32 70.0, %v103_v62  ;;  %v108_v19 = vsub.f32 70.0, %v107_v63  ;;  %v112_v20 = vsub.f32 700.0, %v111_v4  ;;  %v119_v23 = vmul.f32 -770.0, %v118_v10 }
  0x12   :  { %v116_v21 = vsub.f32 300.0, %v115_v7  ;;  %v681_v24 = vmul.f32 0.5, %v93_v59  ;;  %v683_v25 = vadd.f32 %v99_v61, %v98_v60  ;;  %v688_v27 = vmul.f32 -520.0, %v122_v18 }
  0x13   :  { %v686_v26 = vmul.f32 %v631_v33, %v104_v16  ;;  %v691_v28 = vmul.f32 %v636_v34, %v108_v19  ;;  %v694_v29 = vmul.f32 %v653_v42, %v112_v20  ;;  %v120_v31 = vsub.f32 300.0, %v119_v23 }
  0x14   :  { %v126_v32 = vmul.f32 100.0, %v631_v33  ;;  %v698_v37 = vmul.f32 %v609_v17, %v116_v21  ;;  %v124_v38 = vsub.f32 100.0, %v688_v27  ;;  %v127_v39 = vmul.f32 100.0, %v636_v34 }
  0x15   :  { %v128_v40 = vmul.f32 100.0, %v653_v42  ;;  %v129_v41 = vmul.f32 100.0, %v609_v17  ;;  %v130_v43 = vmul.f32 100.0, %v582_v8  ;;  %v131_v44 = vmul.f32 100.0, %v617_v22 }
  0x16   :  { %v137_v45 = vmul.f32 %v617_v22, %v126_v32  ;;  %v121_v46 = vmul.f32 %v582_v8, %v120_v31  ;;  %v132_v49 = vmul.f32 %v617_v22, %v127_v39  ;;  %v140_v52 = vmul.f32 %v582_v8, %v126_v32 }
  0x17   :  { %v133_v50 = vmul.f32 %v582_v8, %v128_v40  ;;  %v136_v51 = vmul.f32 %v609_v17, %v128_v40  ;;  %v141_v53 = vmul.f32 %v609_v17, %v127_v39  ;;  %v144_v54 = vmul.f32 %v653_v42, %v127_v39 }
  0x18   :  { %v145_v56 = vmul.f32 %v636_v34, %v128_v40  ;;  %v148_v59 = vmul.f32 %v617_v22, %v130_v43  ;;  %v149_v60 = vmul.f32 %v582_v8, %v131_v44  ;;  %v152_v63 = vmul.f32 %v631_v33, %v128_v40 }
  0x19   :  { %v134_v57 = vsub.f32 %v132_v49, %v133_v50  ;;  %v138_v58 = vsub.f32 %v136_v51, %v137_v45  ;;  %v142_v61 = vsub.f32 %v140_v52, %v141_v53  ;;  %v153_v4 = vmul.f32 %v653_v42, %v126_v32  ;;  %v728_v49 = vld [vmem:[%s1077_s1] sm:$0xff] }
  0x1a   :  { %v146_v62 = vsub.f32 %v144_v54, %v145_v56  ;;  %v150_v16 = vsub.f32 %v148_v59, %v149_v60  ;;  %v156_v18 = vmul.f32 %v609_v17, %v131_v44  ;;  %v157_v23 = vmul.f32 %v617_v22, %v129_v41 }
  0x1b   :  { %v135_v7 = vsub.f32 0.0, %v134_v57  ;;  %v139_v10 = vsub.f32 0.0, %v138_v58  ;;  %v143_v19 = vsub.f32 0.0, %v142_v61  ;;  %v154_v21 = vsub.f32 %v152_v63, %v153_v4  ;;  %v752_v57 = vld [vmem:[%s1077_s1 + $0x20] sm:$0xff] }
  0x1c   :  { %v147_v20 = vsub.f32 0.0, %v146_v62  ;;  %v160_v27 = vmul.f32 %v636_v34, %v126_v32  ;;  %v161_v31 = vmul.f32 %v631_v33, %v127_v39  ;;  %v164_v45 = vmul.f32 %v582_v8, %v129_v41  ;;  %v734_v32 = vld [vmem:[%s1077_s1 + $0x8] sm:$0xff]  ;;  %v739_v39 = vld [vmem:[%s1077_s1 + $0x10] sm:$0xff]  ;;  %v744_v41 = vld [vmem:[%s1077_s1 + $0x18] sm:$0xff]  ;;  %1086 = vst [vmem:[#allocation3_spill] sm:$0xff] %v752_v57 }
  0x1d   :  { %v165_v40 = vmul.f32 %v609_v17, %v130_v43  ;;  %v155_v44 = vsub.f32 0.0, %v154_v21  ;;  %v158_v51 = vsub.f32 %v156_v18, %v157_v23  ;;  %v168_v52 = vmul.f32 -9103.68, %v638_v35  ;;  %1085 = vst [vmem:[#allocation2_spill] sm:$0xff] %v744_v41 }
  0x1e   :  { %v151_v50 = vsub.f32 %v147_v20, %v150_v16  ;;  %v162_v43 = vsub.f32 %v160_v27, %v161_v31  ;;  %v169_v54 = vmul.f32 -9103.68, %v640_v36  ;;  %v170_v56 = vmul.f32 -9103.68, %v1079_v47  ;;  %v766_v27 = vld [vmem:[%s1077_s1 + $0x28] sm:$0xff] }
  0x1f   :  { %v166_v53 = vsub.f32 %v164_v45, %v165_v40  ;;  %v159_v58 = vsub.f32 %v155_v44, %v158_v51  ;;  %v171_v59 = vmul.f32 2016.936, %v640_v36  ;;  %v172_v60 = vmul.f32 2016.936, %v638_v35  ;;  %1087 = vst [vmem:[#allocation4_spill] sm:$0xff] %v766_v27 }
  0x20   :  { %v175_v61 = vsub.f32 %v728_v49, %v135_v7  ;;  %v163_v62 = vsub.f32 0.0, %v162_v43  ;;  %v180_v63 = vsub.f32 %v734_v32, %v139_v10  ;;  %v185_v4 = vsub.f32 %v739_v39, %v143_v19 }
  0x21   :  { %v190_v16 = vsub.f32 %v744_v41, %v151_v50  ;;  %v125_v18 = vmul.f32 %v617_v22, %v124_v38  ;;  %v173_v20 = vsub.f32 0.0, %v172_v60  ;;  %v195_v23 = vsub.f32 %v752_v57, %v159_v58 }
  0x22   :  { %v176_v21 = vsub.f32 %v175_v61, %v686_v26  ;;  %v167_v7 = vsub.f32 %v163_v62, %v166_v53  ;;  %v181_v31 = vsub.f32 %v180_v63, %v691_v28  ;;  %v186_v10 = vsub.f32 %v185_v4, %v694_v29 }
  0x23   :  { %v191_v19 = vsub.f32 %v190_v16, %v698_v37  ;;  %v772_v45 = vmul.f32 0.5, %v683_v25  ;;  %v196_v40 = vsub.f32 %v195_v23, %v121_v46  ;;  %v210_v26 = vmul.f32 0.1, %v678_v15 }
  0x24   :  { %v177_v38 = vsub.f32 %v176_v21, %v168_v52  ;;  %v182_v50 = vsub.f32 %v181_v31, %v169_v54  ;;  %v187_v44 = vsub.f32 %v186_v10, %v170_v56  ;;  %v200_v43 = vsub.f32 %v766_v27, %v167_v7 }
  0x25   :  { %v192_v51 = vsub.f32 %v191_v19, %v171_v59  ;;  %v197_v58 = vsub.f32 %v196_v40, %v173_v20  ;;  %v208_v28 = vmul.f32 0.1, %v676_v13  ;;  %v212_v29 = vmul.f32 0.1, %v681_v24 }
  0x26   :  { %v776_v53 = vmul.f32 0.01, %v177_v38  ;;  %v201_v37 = vsub.f32 %v200_v43, %v125_v18  ;;  %v780_v60 = vmul.f32 0.01, %v182_v50  ;;  %v782_v25 = vmul.f32 0.01, %v187_v44 }
  0x27   :  { %v784_v46 = vmul.f32 0.01, %v192_v51  ;;  %v786_v52 = vmul.f32 0.01, %v197_v58  ;;  %v789_v54 = vadd.f32 %v555_v1, %v210_v26  ;;  %v214_v56 = vmul.f32 0.1, %v772_v45 }
  0x28   :  { %v216_v59 = vmul.f32 0.1, %v776_v53  ;;  %v65_v61 = vadd.f32 %v662_v48, %v668_v55  ;;  %v795_v62 = vmul.f32 0.01, %v201_v37  ;;  %v218_v63 = vmul.f32 0.1, %v780_v60 }
  0x29   :  { %1088 = vst [vmem:[#allocation5_spill] sm:$0xff] %v786_v52  ;;  %v220_v4 = vmul.f32 0.1, %v782_v25  ;;  %v800_v16 = vadd.f32 %v550_v0, %v208_v28  ;;  %v803_v18 = vadd.f32 %v560_v2, %v212_v29  ;;  %v806_v20 = vadd.f32 %v565_v3, %v214_v56 }
  0x2a   :  { %1089 = vst [vmem:[#allocation6_spill] sm:$0xff] %v795_v62  ;;  %v251_v21 = vmul.f32 %v789_v54, %v789_v54  ;;  %v811_v48 = vadd.f32 %v631_v33, %v216_v59  ;;  %v814_v55 = vadd.f32 %v636_v34, %v218_v63  ;;  %v222_v23 = vmul.f32 0.1, %v784_v46 }
  0x2b   :  { %v224_v7 = vmul.f32 0.1, %v786_v52  ;;  %v819_v31 = vadd.f32 %v653_v42, %v220_v4  ;;  %v822_v10 = vmul.f32 0.1, %v795_v62  ;;  %v252_v19 = vmul.f32 %v803_v18, %v803_v18 }
  0x2c   :  { %v256_v38 = vmul.f32 %v789_v54, %v800_v16  ;;  %v228_v40 = vmul.f32 0.05, %v65_v61  ;;  %v257_v26 = vmul.f32 %v806_v20, %v803_v18  ;;  %v260_v50 = vmul.f32 %v803_v18, %v800_v16 }
  0x2d   :  { %v261_v44 = vmul.f32 %v806_v20, %v789_v54  ;;  %v253_v51 = vadd.f32 %v252_v19, %v251_v21  ;;  %v44_v43 = vadd.f32 %v586_v9, %v575_v6  ;;  %v47_v58 = vadd.f32 %v592_v11, %v571_v5 }
  0x2e   :  { %v52_v28 = vsub.f32 %v596_v12, %v601_v14  ;;  %v258_v29 = vsub.f32 %v256_v38, %v257_v26  ;;  %v264_v59 = vadd.f32 %v257_v26, %v256_v38  ;;  %v266_v6 = vmul.f32 %v800_v16, %v800_v16 }
  0x2f   :  { %v262_v37 = vadd.f32 %v261_v44, %v260_v50  ;;  %v274_v56 = vsub.f32 %v260_v50, %v261_v44  ;;  %v254_v61 = vmul.f32 2.0, %v253_v51  ;;  %v45_v63 = vmul.f32 2.0, %v44_v43 }
  0x30   :  { %v48_v4 = vmul.f32 2.0, %v47_v58  ;;  %v53_v47 = vmul.f32 2.0, %v52_v28  ;;  %v259_v27 = vmul.f32 2.0, %v258_v29  ;;  %v265_v57 = vmul.f32 2.0, %v264_v59 }
  0x31   :  { %v263_v62 = vmul.f32 2.0, %v262_v37  ;;  %v255_v9 = vsub.f32 1.0, %v254_v61  ;;  %v66_v5 = vmul.f32 %v631_v33, %v45_v63  ;;  %v267_v38 = vadd.f32 %v266_v6, %v252_v19 }
  0x32   :  { %v49_v52 = vsub.f32 1.0, %v48_v4  ;;  %v69_v11 = vmul.f32 %v653_v42, %v53_v47  ;;  %v282_v12 = vmul.f32 %v259_v27, %v814_v55  ;;  %v270_v26 = vmul.f32 %v803_v18, %v789_v54 }
  0x33   :  { %v284_v14 = vmul.f32 %v263_v62, %v819_v31  ;;  %v281_v50 = vmul.f32 %v255_v9, %v811_v48  ;;  %v271_v51 = vmul.f32 %v806_v20, %v800_v16  ;;  %v286_v43 = vmul.f32 %v265_v57, %v811_v48 }
  0x34   :  { %v67_v44 = vmul.f32 %v636_v34, %v49_v52  ;;  %v268_v58 = vmul.f32 2.0, %v267_v38  ;;  %v71_v47 = vmul.f32 %v631_v33, %v638_v35  ;;  %v72_v27 = vmul.f32 %v636_v34, %v640_v36 }
  0x35   :  { %v1090_v62 = vsub.f32 1.0, %v624_v30  ;;  %v283_v28 = vadd.f32 %v282_v12, %v281_v50  ;;  %v272_v37 = vsub.f32 %v270_v26, %v271_v51  ;;  %v276_v52 = vadd.f32 %v271_v51, %v270_v26 }
  0x36   :  { %v68_v29 = vadd.f32 %v67_v44, %v66_v5  ;;  %v269_v59 = vsub.f32 1.0, %v268_v58  ;;  %v73_v61 = vadd.f32 %v72_v27, %v71_v47  ;;  %v860_v63 = vmul.f32 2.0, %v274_v56 }
  0x37   :  { %v74_v19 = vmul.f32 %v653_v42, %v1090_v62  ;;  %v278_v57 = vadd.f32 %v266_v6, %v251_v21  ;;  %v285_v4 = vadd.f32 %v284_v14, %v283_v28  ;;  %v273_v38 = vmul.f32 2.0, %v272_v37 }
  0x38   :  { %v70_v9 = vadd.f32 %v69_v11, %v68_v29  ;;  %v862_v35 = vmul.f32 2.0, %v276_v52  ;;  %v287_v36 = vmul.f32 %v269_v59, %v814_v55  ;;  %v291_v5 = vmul.f32 %v860_v63, %v811_v48  ;;  %v417_v11 = vld [vmem:[%s1076_s0] sm:$0xff] }
  0x39   :  { %v75_v41 = vadd.f32 %v74_v19, %v73_v61  ;;  %v865_v30 = vmul.f32 2.0, %v278_v57  ;;  %v870_v12 = vadd.f32 %v609_v17, %v222_v23  ;;  %v418_v26 = vmul.f32 0.05, %v285_v4 }
  0x3a   :  { %v289_v56 = vmul.f32 %v273_v38, %v819_v31  ;;  %v292_v21 = vmul.f32 %v862_v35, %v814_v55  ;;  %v876_v6 = vadd.f32 %v582_v8, %v224_v7  ;;  %v288_v14 = vadd.f32 %v287_v36, %v286_v43 }
  0x3b   :  { %v280_v50 = vsub.f32 1.0, %v865_v30  ;;  %v231_v44 = vmul.f32 0.05, %v676_v13  ;;  %v885_v23 = vadd.f32 %v617_v22, %v822_v10  ;;  %v419_v51 = vadd.f32 %v418_v26, %v228_v40 }
  0x3c   :  { %v229_v58 = vmul.f32 0.05, %v70_v9  ;;  %v293_v47 = vadd.f32 %v292_v21, %v291_v5  ;;  %v290_v27 = vadd.f32 %v289_v56, %v288_v14  ;;  %v230_v62 = vmul.f32 0.05, %v75_v41  ;;  %v517_v9 = vld [vmem:[%s1076_s0 + $0x10] sm:$0xff] }
  0x3d   :  { %v294_v7 = vmul.f32 %v280_v50, %v819_v31  ;;  %v232_v19 = vmul.f32 0.05, %v678_v15  ;;  %v420_v43 = vadd.f32 %v419_v51, %v417_v11  ;;  %v233_v28 = vmul.f32 0.05, %v681_v24  ;;  %v516_v15 = vld [vmem:[%s1076_s0 + $0x8] sm:$0xff] }
  0x3e   :  { %v234_v13 = vmul.f32 0.05, %v772_v45  ;;  %v296_v29 = vsub.f32 0.0, %v800_v16  ;;  %v423_v10 = vmul.f32 0.05, %v290_v27  ;;  %v241_v40 = vadd.f32 %v550_v0, %v231_v44 }
  0x3f   :  { %v295_v37 = vadd.f32 %v294_v7, %v293_v47  ;;  %v298_v41 = vmul.f32 %v876_v6, %v789_v54  ;;  %468 = vst [vmem:[%s1078_s2] sm:$0xff] %v420_v43  ;;  %v300_v45 = vmul.f32 %v885_v23, %v803_v18  ;;  %v303_v52 = vmul.f32 %v870_v12, %v806_v20 }
  0x40   :  { %v297_v24 = vmul.f32 %v296_v29, %v870_v12  ;;  %v304_v0 = vmul.f32 %v876_v6, %v803_v18  ;;  %v424_v59 = vadd.f32 %v423_v10, %v229_v58  ;;  %v306_v57 = vmul.f32 %v885_v23, %v789_v54 }
  0x41   :  { %v428_v61 = vmul.f32 0.05, %v295_v37  ;;  %v309_v4 = vmul.f32 %v870_v12, %v803_v18  ;;  %v310_v5 = vmul.f32 %v876_v6, %v806_v20  ;;  %v312_v26 = vmul.f32 %v885_v23, %v800_v16 }
  0x42   :  { %v299_v38 = vsub.f32 %v297_v24, %v298_v41  ;;  %v305_v36 = vsub.f32 %v303_v52, %v304_v0  ;;  %v425_v56 = vadd.f32 %v516_v15, %v424_v59  ;;  %v315_v11 = vsub.f32 0.0, %v789_v54 }
  0x43   :  { %v429_v21 = vadd.f32 %v428_v61, %v230_v62  ;;  %v317_v14 = vmul.f32 %v876_v6, %v800_v16  ;;  %v311_v51 = vadd.f32 %v310_v5, %v309_v4  ;;  %v319_v58 = vmul.f32 %v885_v23, %v806_v20 }
  0x44   :  { %v301_v18 = vsub.f32 %v299_v38, %v300_v45  ;;  %v307_v44 = vadd.f32 %v306_v57, %v305_v36  ;;  %518 = vst [vmem:[%s1078_s2 + $0x8] sm:$0xff] %v425_v56  ;;  %v316_v27 = vmul.f32 %v315_v11, %v870_v12  ;;  %v322_v62 = vand.u32 2147483647, %v811_v48 }
  0x45   :  { %v430_v47 = vadd.f32 %v517_v9, %v429_v21  ;;  %v932_v54 = vmul.f32 100.0, %v814_v55  ;;  %v242_v16 = vadd.f32 %v555_v1, %v232_v19  ;;  %v313_v29 = vsub.f32 %v311_v51, %v312_v26 }
  0x46   :  { %v302_v7 = vmul.f32 0.5, %v301_v18  ;;  %v308_v43 = vmul.f32 0.5, %v307_v44  ;;  %v318_v20 = vadd.f32 %v317_v14, %v316_v27  ;;  %v323_v10 = vmul.f32 -740.0, %v322_v62 }
  0x47   :  { %519 = vst [vmem:[%s1078_s2 + $0x10] sm:$0xff] %v430_v47  ;;  %v939_v37 = vmul.f32 100.0, %v819_v31  ;;  %v352_v41 = vmul.f32 %v932_v54, %v885_v23  ;;  %v243_v15 = vadd.f32 %v560_v2, %v233_v28  ;;  %v314_v24 = vmul.f32 0.5, %v313_v29 }
  0x48   :  { %v431_v45 = vmul.f32 0.05, %v302_v7  ;;  %v433_v1 = vmul.f32 0.05, %v308_v43  ;;  %v244_v19 = vadd.f32 %v565_v3, %v234_v13  ;;  %v320_v52 = vadd.f32 %v319_v58, %v318_v20 }
  0x49   :  { %v324_v0 = vsub.f32 70.0, %v323_v10  ;;  %v353_v59 = vmul.f32 %v939_v37, %v876_v6  ;;  %v435_v4 = vmul.f32 0.05, %v314_v24  ;;  %v235_v9 = vmul.f32 0.05, %v776_v53 }
  0x4a   :  { %v947_v61 = vadd.f32 %v431_v45, %v241_v40  ;;  %v949_v57 = vadd.f32 %v433_v1, %v242_v16  ;;  %v321_v38 = vmul.f32 0.5, %v320_v52  ;;  %v388_v2 = vmul.f32 -9103.68, %v860_v63 }
  0x4b   :  { %v354_v36 = vsub.f32 %v352_v41, %v353_v59  ;;  %v326_v28 = vand.u32 2147483647, %v814_v55  ;;  %v954_v5 = vadd.f32 %v435_v4, %v243_v15  ;;  %v325_v40 = vmul.f32 %v324_v0, %v811_v48 }
  0x4c   :  { %v451_v3 = vmul.f32 %v947_v61, %v947_v61  ;;  %v452_v13 = vmul.f32 %v949_v57, %v949_v57  ;;  %v437_v26 = vmul.f32 0.05, %v321_v38  ;;  %v962_v53 = vmul.f32 100.0, %v811_v48 }
  0x4d   :  { %v355_v56 = vsub.f32 0.0, %v354_v36  ;;  %v327_v21 = vmul.f32 -990.0, %v326_v28  ;;  %v454_v14 = vmul.f32 %v954_v5, %v954_v5  ;;  %v236_v18 = vmul.f32 0.05, %v780_v60 }
  0x4e   :  { %v453_v11 = vadd.f32 %v452_v13, %v451_v3  ;;  %v356_v44 = vmul.f32 %v939_v37, %v870_v12  ;;  %v969_v51 = vadd.f32 %v437_v26, %v244_v19  ;;  %v357_v27 = vmul.f32 %v962_v53, %v885_v23 }
  0x4f   :  { %v394_v58 = vsub.f32 %v728_v49, %v355_v56  ;;  %v328_v47 = vsub.f32 70.0, %v327_v21  ;;  %v245_v16 = vadd.f32 %v631_v33, %v235_v9  ;;  %v330_v7 = vand.u32 2147483647, %v819_v31 }
  0x50   :  { %v455_v62 = vadd.f32 %v454_v14, %v453_v11  ;;  %v360_v43 = vmul.f32 %v962_v53, %v876_v6  ;;  %v456_v60 = vmul.f32 %v969_v51, %v969_v51  ;;  %v358_v20 = vsub.f32 %v356_v44, %v357_v27 }
  0x51   :  { %v395_v29 = vsub.f32 %v394_v58, %v325_v40  ;;  %v237_v10 = vmul.f32 0.05, %v782_v25  ;;  %v246_v49 = vadd.f32 %v636_v34, %v236_v18  ;;  %v389_v41 = vmul.f32 -9103.68, %v862_v35 }
  0x52   :  { %v331_v15 = vmul.f32 -1800.0, %v330_v7  ;;  %v361_v33 = vmul.f32 %v932_v54, %v870_v12  ;;  %v985_v24 = vadd.f32 %v456_v60, %v455_v62  ;;  %v329_v1 = vmul.f32 %v328_v47, %v814_v55 }
  0x53   :  { %v396_v45 = vsub.f32 %v395_v29, %v388_v2  ;;  %v359_v19 = vsub.f32 0.0, %v358_v20  ;;  %v334_v59 = vand.u32 2147483647, %v870_v12  ;;  %v990_v25 = vmul.f32 100.0, %v876_v6 }
  0x54   :  { %v332_v52 = vsub.f32 700.0, %v331_v15  ;;  %v362_v0 = vsub.f32 %v360_v43, %v361_v33  ;;  %530 = vrsqrt.f32 %v985_v24  ;;  %v247_v9 = vadd.f32 %v653_v42, %v237_v10 }
  0x55   :  { %v411_v34 = vmul.f32 0.01, %v396_v45  ;;  %v397_v4 = vsub.f32 %v734_v32, %v359_v19  ;;  %v390_v2 = vmul.f32 -9103.68, %v280_v50  ;;  %v335_v28 = vmul.f32 -670.0, %v334_v59 }
  0x56   :  { %v333_v38 = vmul.f32 %v332_v52, %v819_v31  ;;  %v363_v36 = vsub.f32 0.0, %v362_v0  ;;  %v351_v40 = vmul.f32 100.0, %v885_v23  ;;  %v364_v26 = vmul.f32 %v932_v54, %v819_v31 }
  0x57   :  { %v439_v3 = vmul.f32 0.05, %v411_v34  ;;  %v398_v13 = vsub.f32 %v397_v4, %v329_v1  ;;  %v336_v21 = vsub.f32 300.0, %v335_v28  ;;  %v365_v42 = vmul.f32 %v939_v37, %v814_v55  ;;  %v1091_v34 = vld [vmem:[#allocation2_spill] sm:$0xff] }
  0x58   :  { %v400_v56 = vsub.f32 %v739_v39, %v363_v36  ;;  %v368_v32 = vmul.f32 %v990_v25, %v885_v23  ;;  %v238_v50 = vmul.f32 0.05, %v784_v46  ;;  %v369_v14 = vmul.f32 %v351_v40, %v876_v6 }
  0x59   :  { %v440_v11 = vadd.f32 %v439_v3, %v245_v16  ;;  %v399_v30 = vsub.f32 %v398_v13, %v389_v41  ;;  %vm464_vm0 = vweird.f32 %v985_v24  ;;  %v366_v44 = vsub.f32 %v364_v26, %v365_v42  ;;  %v1092_v13 = vld [vmem:[#allocation5_spill] sm:$0xff] }
  0x5a   :  { %v401_v18 = vsub.f32 %v400_v56, %v333_v38  ;;  %v391_v58 = vmul.f32 2016.936, %v862_v35  ;;  %v531_v39 = vpop.eup %530  ;;  %v370_v27 = vsub.f32 %v368_v32, %v369_v14  ;;  %v338_v62 = vand.u32 2147483647, %v876_v6 }
  0x5b   :  { %524 = vst [vmem:[%s1078_s2 + $0x38] sm:$0xff] %v440_v11  ;;  %v412_v47 = vmul.f32 0.01, %v399_v30  ;;  %v349_v16 = vmul.f32 100.0, %v870_v12  ;;  %v459_v46 = vmul.f32 %v531_v39, %v985_v24  ;;  %v337_v43 = vmul.f32 %v336_v21, %v870_v12 }
  0x5c   :  { %v402_v7 = vsub.f32 %v401_v18, %v390_v2  ;;  %v367_v60 = vsub.f32 0.0, %v366_v44  ;;  %vm465_vm1 = vweird.f32 %v531_v39  ;;  %v339_v35 = vmul.f32 -770.0, %v338_v62 }
  0x5d   :  { %v441_v29 = vmul.f32 0.05, %v412_v47  ;;  %v372_v20 = vmul.f32 %v939_v37, %v811_v48  ;;  %v460_v10 = vmul.f32 %v531_v39, %v459_v46  ;;  %v373_v33 = vmul.f32 %v962_v53, %v819_v31  ;;  %vm466_vm2 = vmor %vm464_vm0, %vm465_vm1 }
  0x5e   :  { %v413_v41 = vmul.f32 0.01, %v402_v7  ;;  %v371_v15 = vsub.f32 %v367_v60, %v370_v27  ;;  %v340_v1 = vsub.f32 300.0, %v339_v35  ;;  %v376_v19 = vmul.f32 %v351_v40, %v870_v12  ;;  %v1095_v7 = vld [vmem:[#allocation4_spill] sm:$0xff] }
  0x5f   :  { %v442_v45 = vadd.f32 %v441_v29, %v246_v49  ;;  %v377_v52 = vmul.f32 %v349_v16, %v885_v23  ;;  %v461_v0 = vmul.f32 0.5, %v460_v10  ;;  %v374_v38 = vsub.f32 %v372_v20, %v373_v33 }
  0x60   :  { %v443_v59 = vmul.f32 0.05, %v413_v41  ;;  %v403_v4 = vsub.f32 %v1091_v34, %v371_v15  ;;  %v248_v37 = vadd.f32 %v609_v17, %v238_v50  ;;  %v392_v31 = vmul.f32 2016.936, %v860_v63 }
  0x61   :  { %525 = vst [vmem:[%s1078_s2 + $0x40] sm:$0xff] %v442_v45  ;;  %v378_v36 = vsub.f32 %v376_v19, %v377_v52  ;;  %v462_v49 = vsub.f32 1.5, %v461_v0  ;;  %v375_v3 = vsub.f32 0.0, %v374_v38  ;;  %v239_v40 = vmul.f32 0.05, %v1092_v13 }
  0x62   :  { %v444_v2 = vadd.f32 %v443_v59, %v247_v9  ;;  %v404_v28 = vsub.f32 %v403_v4, %v337_v43  ;;  %v341_v26 = vmul.f32 %v340_v1, %v876_v6  ;;  %v342_v56 = vand.u32 2147483647, %v885_v23 }
  0x63   :  { %v380_v17 = vmul.f32 %v962_v53, %v814_v55  ;;  %v463_v21 = vmul.f32 %v531_v39, %v462_v49  ;;  %v379_v9 = vsub.f32 %v375_v3, %v378_v36  ;;  %v381_v24 = vmul.f32 %v932_v54, %v811_v48  ;;  %v1093_v55 = vld [vmem:[#allocation3_spill] sm:$0xff] }
  0x64   :  { %526 = vst [vmem:[%s1078_s2 + $0x48] sm:$0xff] %v444_v2  ;;  %v405_v63 = vsub.f32 %v404_v28, %v391_v58  ;;  %v393_v42 = vsub.f32 0.0, %v392_v31  ;;  %v343_v32 = vmul.f32 -520.0, %v342_v56  ;;  %v384_v11 = vmul.f32 %v349_v16, %v876_v6  ;;  %v1094_v16 = vld [vmem:[#allocation6_spill] sm:$0xff] }
  0x65   :  { %v385_v30 = vmul.f32 %v990_v25, %v870_v12  ;;  %v467_v50 = vsel %vm466_vm2, %v531_v39, %v463_v21  ;;  %v406_v53 = vsub.f32 %v1093_v55, %v379_v9  ;;  %v382_v18 = vsub.f32 %v380_v17, %v381_v24 }
  0x66   :  { %v414_v14 = vmul.f32 0.01, %v405_v63  ;;  %v473_v44 = vmul.f32 %v467_v50, %v947_v61  ;;  %v476_v58 = vmul.f32 %v467_v50, %v949_v57  ;;  %v479_v47 = vmul.f32 %v467_v50, %v954_v5 }
  0x67   :  { %v482_v48 = vmul.f32 %v467_v50, %v969_v51  ;;  %v407_v27 = vsub.f32 %v406_v53, %v341_v26  ;;  %v344_v62 = vsub.f32 100.0, %v343_v32  ;;  %v383_v6 = vsub.f32 0.0, %v382_v18 }
  0x68   :  { %v445_v54 = vmul.f32 0.05, %v414_v14  ;;  %520 = vst [vmem:[%s1078_s2 + $0x18] sm:$0xff] %v473_v44  ;;  %v386_v12 = vsub.f32 %v384_v11, %v385_v30  ;;  %v249_v51 = vadd.f32 %v582_v8, %v239_v40  ;;  %v240_v46 = vmul.f32 0.05, %v1094_v16 }
  0x69   :  { %521 = vst [vmem:[%s1078_s2 + $0x20] sm:$0xff] %v476_v58  ;;  %v408_v25 = vsub.f32 %v407_v27, %v393_v42  ;;  %v345_v57 = vmul.f32 %v344_v62, %v885_v23 }
  0x6a   :  { %v446_v61 = vadd.f32 %v445_v54, %v248_v37  ;;  %522 = vst [vmem:[%s1078_s2 + $0x28] sm:$0xff] %v479_v47  ;;  %v387_v5 = vsub.f32 %v383_v6, %v386_v12  ;;  %v250_v23 = vadd.f32 %v617_v22, %v240_v46 }
  0x6b   :  { %523 = vst [vmem:[%s1078_s2 + $0x30] sm:$0xff] %v482_v48  ;;  %v415_v39 = vmul.f32 0.01, %v408_v25 }
  0x6c   :  { %527 = vst [vmem:[%s1078_s2 + $0x50] sm:$0xff] %v446_v61  ;;  %v409_v43 = vsub.f32 %v1095_v7, %v387_v5 }
  0x6d   :  { %v447_v60 = vmul.f32 0.05, %v415_v39 }
  0x6e   :  { %v410_v29 = vsub.f32 %v409_v43, %v345_v57 }
  0x6f   :  { %v448_v35 = vadd.f32 %v447_v60, %v249_v51 }
  0x70   :  { %v416_v20 = vmul.f32 0.01, %v410_v29 }
  0x71   :  { %528 = vst [vmem:[%s1078_s2 + $0x58] sm:$0xff] %v448_v35 }
  0x72   :  { %v449_v8 = vmul.f32 0.05, %v416_v20 }
  0x74   :  { %v450_v10 = vadd.f32 %v449_v8, %v250_v23 }
  0x76   :  { %529 = vst [vmem:[%s1078_s2 + $0x60] sm:$0xff] %v450_v10 }

</bundles_post_ra>
